<compile_context>
chip_gen: v7x
topology: tpu7x:2x2x1
jax: 0.10.0
libtpu: 0.0.40
codegen_flags: <defaults>
</compile_context>

<pallas_src>
import functools

import jax
import jax.numpy as jnp
from jax.experimental import pallas as pl
from jax.experimental.pallas import tpu as pltpu

_LANE = 128
_SUBLANE = 8


def _round_up(x, m):
    return ((x + m - 1) // m) * m


def lstm_kernel(x_ref, wih_ref, whh_ref, b_ref, h_out_ref,
                gx_ref, h_ref, c_ref,
                *, seq_len, chunk_len, batch_pad, hidden_pad, need_mask,
                unroll):
    """One grid step == one chunk of `chunk_len` timesteps.

    x_ref   : (Tc*Bp, D)           current chunk of inputs (time-major, flattened)
    wih_ref : (D, 4*Hp)            W_ih^T, gate-blocked, i/f/o cols pre-scaled 0.5
    whh_ref : (Hp, 4*Hp)           W_hh^T, gate-blocked, i/f/o cols pre-scaled 0.5
    b_ref   : (1, 4*Hp)            b_ih + b_hh, gate-blocked, i/f/o pre-scaled 0.5
    h_out_ref : (Bp, Hp)           final hidden state (written at the last chunk)
    gx_ref  : VMEM (Tc*Bp, 4*Hp)   scratch: hoisted x-projection for the chunk
    h_ref, c_ref : VMEM (Bp, Hp)   recurrent state, persists across chunks
    """
    chunk = pl.program_id(0)
    Bp = batch_pad
    Hp = hidden_pad

    @pl.when(chunk == 0)
    def _():
        h_ref[...] = jnp.zeros_like(h_ref)
        c_ref[...] = jnp.zeros_like(c_ref)

    # Hoisted input projection: ONE large MXU matmul per chunk, f32 accumulate,
    # bias folded in once (not re-added every serial step).
    gx_ref[...] = (
        jnp.dot(x_ref[...], wih_ref[...], preferred_element_type=jnp.float32)
        + b_ref[...]
    )

    whh = whh_ref[...]                 # hoisted out of the recurrence
    mm_f32 = (whh.dtype == jnp.float32)

    def step(s, carry):
        h, c = carry
        row = pl.multiple_of(s * Bp, Bp)
        h_mm = h if mm_f32 else h.astype(whh.dtype)   # bf16 MXU input, f32 acc
        gates = gx_ref[pl.ds(row, Bp), :] + jnp.dot(
            h_mm, whh, preferred_element_type=jnp.float32)      # (Bp, 4Hp)
        # i/f/o column blocks were pre-scaled by 0.5 in the wrapper, so one
        # tanh over the whole gate matrix yields tanh(z/2) for i/f/o
        # (sigmoid(z) = 0.5*(tanh(z/2)+1)) and tanh(z) for the g block:
        # a single EUP push per timestep instead of four.
        t = jnp.tanh(gates)
        i_g = 0.5 * (t[:, 0 * Hp:1 * Hp] + 1.0)
        f_g = 0.5 * (t[:, 1 * Hp:2 * Hp] + 1.0)
        g_g = t[:, 2 * Hp:3 * Hp]
        o_g = 0.5 * (t[:, 3 * Hp:4 * Hp] + 1.0)
        c_new = f_g * c + i_g * g_g
        h_new = o_g * jnp.tanh(c_new)
        if need_mask:   # only emitted when T is not a multiple of the chunk
            valid = (chunk * chunk_len + s) < seq_len
            h_new = jnp.where(valid, h_new, h)
            c_new = jnp.where(valid, c_new, c)
        return h_new, c_new

    h, c = jax.lax.fori_loop(0, chunk_len, step,
                             (h_ref[...], c_ref[...]), unroll=unroll)
    h_ref[...] = h
    c_ref[...] = c

    @pl.when(chunk == pl.num_programs(0) - 1)
    def _():
        h_out_ref[...] = h.astype(h_out_ref.dtype)


def lstm_model_forward(x_btd, params, *, chunk_len=16,
                       matmul_dtype=jnp.float32):
    """x_btd: (batch, seq, input_dim) float32 (PyTorch batch_first layout)."""
    w_ih, w_hh, b_ih, b_hh, w_fc, b_fc = (
        params["w_ih"], params["w_hh"], params["b_ih"], params["b_hh"],
        params["w_fc"], params["b_fc"],
    )
    B, T, D = x_btd.shape
    H = w_hh.shape[1]

    Bp = _round_up(B, _SUBLANE)     # sublane-dense batch
    Hp = _round_up(H, _LANE)        # lane-dense hidden / gate slices
    Tc = max(1, min(chunk_len, T))
    num_chunks = pl.cdiv(T, Tc)
    Tp = num_chunks * Tc

    # Gate order in PyTorch nn.LSTM weights: [i | f | g | o]. Pre-scale the
    # sigmoid gates (i, f, o) by 0.5 so the kernel needs a single tanh push.
    gate_scale = jnp.array([0.5, 0.5, 1.0, 0.5], jnp.float32)

    def prep_gates(w_t):            # (rows, 4H) -> (rows, 4*Hp), gate-blocked
        r = w_t.shape[0]
        w4 = w_t.reshape(r, 4, H) * gate_scale[None, :, None]
        w4 = jnp.pad(w4, ((0, 0), (0, 0), (0, Hp - H)))
        return w4.reshape(r, 4 * Hp)

    wih_t = prep_gates(jnp.transpose(w_ih)).astype(matmul_dtype)   # (D, 4Hp)
    whh_t = jnp.pad(prep_gates(jnp.transpose(w_hh)),
                    ((0, Hp - H), (0, 0))).astype(matmul_dtype)    # (Hp, 4Hp)
    bias = prep_gates((b_ih + b_hh).reshape(1, 4 * H))             # (1, 4Hp) f32

    # (B, T, D) -> (num_chunks, Tc*Bp, D): time-major, zero-pad batch to a
    # sublane multiple and time to a chunk multiple (padded steps are masked
    # inside the kernel when needed).
    x_tbd = jnp.transpose(x_btd, (1, 0, 2))
    x_tbd = jnp.pad(x_tbd, ((0, Tp - T), (0, Bp - B), (0, 0)))
    x_chunks = x_tbd.reshape(num_chunks, Tc * Bp, D).astype(matmul_dtype)

    kernel = functools.partial(
        lstm_kernel, seq_len=T, chunk_len=Tc, batch_pad=Bp, hidden_pad=Hp,
        need_mask=(Tp != T),
        # Full unroll only while gate live-ranges fit the 64-vreg file.
        unroll=(True if Hp <= 256 else min(4, Tc)))

    h_final = pl.pallas_call(
        kernel,
        out_shape=jax.ShapeDtypeStruct((Bp, Hp), jnp.float32),
        grid_spec=pltpu.PrefetchScalarGridSpec(
            num_scalar_prefetch=0,
            grid=(num_chunks,),
            in_specs=[
                # x chunk: squeezed leading dim -> kernel sees the 2D MXU tile.
                pl.BlockSpec((pl.Squeezed(), Tc * Bp, D), lambda c: (c, 0, 0)),
                pl.BlockSpec((D, 4 * Hp), lambda c: (0, 0)),      # W_ih^T
                pl.BlockSpec((Hp, 4 * Hp), lambda c: (0, 0)),     # W_hh^T
                pl.BlockSpec((1, 4 * Hp), lambda c: (0, 0)),      # fused bias
            ],
            out_specs=pl.BlockSpec((Bp, Hp), lambda c: (0, 0)),
            scratch_shapes=[
                pltpu.VMEM((Tc * Bp, 4 * Hp), jnp.float32),  # hoisted x-proj
                pltpu.VMEM((Bp, Hp), jnp.float32),           # h state
                pltpu.VMEM((Bp, Hp), jnp.float32),           # c state
            ],
        ),
        compiler_params=pltpu.CompilerParams(
            dimension_semantics=("arbitrary",),   # sequential recurrence
            # 48 MiB: headroom under v7x's 64 MiB/TC physical VMEM, above
            # v5e/v6e defaults.
            vmem_limit_bytes=48 * 1024 * 1024,
        ),
    )(x_chunks, wih_t, whh_t, bias)

    # Final FC runs once in XLA (kernel returns only the hidden state).
    h = h_final[:B, :H]
    return h @ jnp.transpose(w_fc) + b_fc


def lstm_model_reference(x_btd, params):
    """Pure-JAX reference matching PyTorch nn.LSTM + nn.Linear semantics."""
    w_ih, w_hh, b_ih, b_hh, w_fc, b_fc = (
        params["w_ih"], params["w_hh"], params["b_ih"], params["b_hh"],
        params["w_fc"], params["b_fc"],
    )
    B, T, D = x_btd.shape
    H = w_hh.shape[1]
    h = jnp.zeros((B, H), jnp.float32)
    c = jnp.zeros((B, H), jnp.float32)
    for t in range(T):
        x_t = x_btd[:, t, :]
        gates = x_t @ w_ih.T + b_ih + h @ w_hh.T + b_hh
        i_g = jax.nn.sigmoid(gates[:, 0 * H:1 * H])
        f_g = jax.nn.sigmoid(gates[:, 1 * H:2 * H])
        g_g = jnp.tanh(gates[:, 2 * H:3 * H])
        o_g = jax.nn.sigmoid(gates[:, 3 * H:4 * H])
        c = f_g * c + i_g * g_g
        h = o_g * jnp.tanh(c)
    return h @ w_fc.T + b_fc


def init_params(key, input_dim, hidden_dim, output_dim):
    ks = jax.random.split(key, 6)
    s = 1.0 / jnp.sqrt(hidden_dim)
    u = lambda k, shape: jax.random.uniform(k, shape, jnp.float32, -s, s)
    return {
        "w_ih": u(ks[0], (4 * hidden_dim, input_dim)),
        "w_hh": u(ks[1], (4 * hidden_dim, hidden_dim)),
        "b_ih": u(ks[2], (4 * hidden_dim,)),
        "b_hh": u(ks[3], (4 * hidden_dim,)),
        "w_fc": u(ks[4], (output_dim, hidden_dim)),
        "b_fc": u(ks[5], (output_dim,)),
    }


if __name__ == "__main__":
    B, T, D, H, O = 2, 8, 16, 32, 4
    key = jax.random.PRNGKey(0)
    kx, kp = jax.random.split(key)
    x = jax.random.normal(kx, (B, T, D), jnp.float32)  # (batch, seq, input_dim)
    params = init_params(kp, D, H, O)

    ref = jax.block_until_ready(lstm_model_reference(x, params))

    # f32 matmul path: exact check against the reference.
    out_f32 = jax.block_until_ready(lstm_model_forward(x, params))
    assert out_f32.shape == (B, O)
    assert jnp.allclose(out_f32, ref, atol=1e-5, rtol=1e-5), (out_f32, ref)

    # bf16 matmul path (production setting per perf review): loose check only,
    # since weights/inputs are rounded to bf16 on the MXU.
    out_bf16 = jax.block_until_ready(
        lstm_model_forward(x, params, matmul_dtype=jnp.bfloat16))
    assert out_bf16.shape == (B, O)
    assert bool(jnp.all(jnp.isfinite(out_bf16)))
    assert float(jnp.max(jnp.abs(out_bf16 - ref))) < 0.25, (out_bf16, ref)

    print("KERNEL_OK")
</pallas_src>

<mosaic_0001>
module attributes {stable_mosaic.version = 11 : i64} {
  func.func @lstm_kernel(%arg0: i32, %arg1: memref<1x64x16xf32, #tpu.memory_space<vmem>>, %arg2: memref<16x512xf32, #tpu.memory_space<vmem>>, %arg3: memref<128x512xf32, #tpu.memory_space<vmem>>, %arg4: memref<1x512xf32, #tpu.memory_space<vmem>>, %arg5: memref<8x128xf32, #tpu.memory_space<vmem>>, %arg6: memref<64x512xf32, #tpu.memory_space<vmem>>, %arg7: memref<8x128xf32, #tpu.memory_space<vmem>>, %arg8: memref<8x128xf32, #tpu.memory_space<vmem>>) attributes {dimension_semantics = [#tpu.dimension_semantics<arbitrary>], iteration_bounds = array<i64: 1>, scalar_prefetch = 0 : i64, scratch_operands = 3 : i64, tpu.core_type = #tpu.core_type<tc>, window_params = [{transform_indices = @transform_0, window_bounds = array<i64: 1, 64, 16>}, {pipeline_mode = #tpu.pipeline_mode<synchronous>, transform_indices = @transform_1, window_bounds = array<i64: 16, 512>}, {pipeline_mode = #tpu.pipeline_mode<synchronous>, transform_indices = @transform_2, window_bounds = array<i64: 128, 512>}, {pipeline_mode = #tpu.pipeline_mode<synchronous>, transform_indices = @transform_3, window_bounds = array<i64: 1, 512>}, {pipeline_mode = #tpu.pipeline_mode<synchronous>, transform_indices = @transform_4, window_bounds = array<i64: 8, 128>}]} {
    %c0_i32 = arith.constant 0 : i32
    %0 = arith.cmpi eq, %arg0, %c0_i32 : i32
    %1 = arith.extui %0 : i1 to i32
    %c0_i32_0 = arith.constant 0 : i32
    %2 = arith.cmpi ne, %1, %c0_i32_0 : i32
    scf.if %2 {
      %cst_94 = arith.constant 0.000000e+00 : f32
      %243 = vector.broadcast %cst_94 : f32 to vector<8x128xf32>
      %c0_95 = arith.constant 0 : index
      %c0_96 = arith.constant 0 : index
      %244 = vector.load %arg7[%c0_95, %c0_96] : memref<8x128xf32, #tpu.memory_space<vmem>>, vector<8x128xf32>
      tpu.vector_store %arg7[%c0_95, %c0_96], %243 {strides = array<i32>} : memref<8x128xf32, #tpu.memory_space<vmem>>, vector<8x128xf32>,
      %cst_97 = arith.constant 0.000000e+00 : f32
      %245 = vector.broadcast %cst_97 : f32 to vector<8x128xf32>
      %c0_98 = arith.constant 0 : index
      %c0_99 = arith.constant 0 : index
      %246 = vector.load %arg8[%c0_98, %c0_99] : memref<8x128xf32, #tpu.memory_space<vmem>>, vector<8x128xf32>
      tpu.vector_store %arg8[%c0_98, %c0_99], %245 {strides = array<i32>} : memref<8x128xf32, #tpu.memory_space<vmem>>, vector<8x128xf32>,
    } else {
    }
    %c0 = arith.constant 0 : index
    %c0_1 = arith.constant 0 : index
    %c0_2 = arith.constant 0 : index
    %3 = vector.load %arg1[%c0, %c0_1, %c0_2] : memref<1x64x16xf32, #tpu.memory_space<vmem>>, vector<1x64x16xf32>
    %4 = vector.shape_cast %3 : vector<1x64x16xf32> to vector<64x16xf32>
    %c0_3 = arith.constant 0 : index
    %c0_4 = arith.constant 0 : index
    %5 = vector.load %arg2[%c0_3, %c0_4] : memref<16x512xf32, #tpu.memory_space<vmem>>, vector<16x512xf32>
    %cst = arith.constant dense<0.000000e+00> : vector<64x512xf32>
    %6 = tpu.matmul %4, %5, %cst {dimension_numbers = #tpu.dot_dimension_numbers<[1], [0], [0], [1], [0, 0, 1, 1], [], []>} : vector<64x16xf32>, vector<16x512xf32>, vector<64x512xf32> -> vector<64x512xf32>
    %c0_5 = arith.constant 0 : index
    %c0_6 = arith.constant 0 : index
    %7 = vector.load %arg4[%c0_5, %c0_6] : memref<1x512xf32, #tpu.memory_space<vmem>>, vector<1x512xf32>
    %8 = vector.broadcast %7 : vector<1x512xf32> to vector<64x512xf32>
    %9 = arith.addf %6, %8 : vector<64x512xf32>
    %c0_7 = arith.constant 0 : index
    %c0_8 = arith.constant 0 : index
    %10 = vector.load %arg6[%c0_7, %c0_8] : memref<64x512xf32, #tpu.memory_space<vmem>>, vector<64x512xf32>
    tpu.vector_store %arg6[%c0_7, %c0_8], %9 {strides = array<i32>} : memref<64x512xf32, #tpu.memory_space<vmem>>, vector<64x512xf32>,
    %c0_9 = arith.constant 0 : index
    %c0_10 = arith.constant 0 : index
    %11 = vector.load %arg3[%c0_9, %c0_10] : memref<128x512xf32, #tpu.memory_space<vmem>>, vector<128x512xf32>
    %c0_11 = arith.constant 0 : index
    %c0_12 = arith.constant 0 : index
    %12 = vector.load %arg7[%c0_11, %c0_12] : memref<8x128xf32, #tpu.memory_space<vmem>>, vector<8x128xf32>
    %c0_13 = arith.constant 0 : index
    %c0_14 = arith.constant 0 : index
    %13 = vector.load %arg8[%c0_13, %c0_14] : memref<8x128xf32, #tpu.memory_space<vmem>>, vector<8x128xf32>
    %c0_i32_15 = arith.constant 0 : i32
    %c8_i32 = arith.constant 8 : i32
    %14 = arith.muli %c0_i32_15, %c8_i32 : i32
    %15 = tpu.assume_multiple %14, 8 : i32
    %16 = arith.index_cast %15 : i32 to index
    %c0_16 = arith.constant 0 : index
    %17 = vector.load %arg6[%16, %c0_16] : memref<64x512xf32, #tpu.memory_space<vmem>>, vector<8x512xf32>
    %cst_17 = arith.constant dense<0.000000e+00> : vector<8x512xf32>
    %18 = tpu.matmul %12, %11, %cst_17 {dimension_numbers = #tpu.dot_dimension_numbers<[1], [0], [0], [1], [0, 0, 1, 1], [], []>} : vector<8x128xf32>, vector<128x512xf32>, vector<8x512xf32> -> vector<8x512xf32>
    %19 = arith.addf %17, %18 : vector<8x512xf32>
    %20 = math.tanh %19 : vector<8x512xf32>
    %21 = vector.extract_strided_slice %20 {offsets = [0, 0], sizes = [8, 128], strides = [1, 1]} : vector<8x512xf32> to vector<8x128xf32>
    %cst_18 = arith.constant 1.000000e+00 : f32
    %22 = vector.broadcast %cst_18 : f32 to vector<8x128xf32>
    %23 = arith.addf %21, %22 : vector<8x128xf32>
    %cst_19 = arith.constant 5.000000e-01 : f32
    %24 = vector.broadcast %cst_19 : f32 to vector<8x128xf32>
    %25 = arith.mulf %24, %23 : vector<8x128xf32>
    %26 = vector.extract_strided_slice %20 {offsets = [0, 128], sizes = [8, 128], strides = [1, 1]} : vector<8x512xf32> to vector<8x128xf32>
    %cst_20 = arith.constant 1.000000e+00 : f32
    %27 = vector.broadcast %cst_20 : f32 to vector<8x128xf32>
    %28 = arith.addf %26, %27 : vector<8x128xf32>
    %cst_21 = arith.constant 5.000000e-01 : f32
    %29 = vector.broadcast %cst_21 : f32 to vector<8x128xf32>
    %30 = arith.mulf %29, %28 : vector<8x128xf32>
    %31 = vector.extract_strided_slice %20 {offsets = [0, 256], sizes = [8, 128], strides = [1, 1]} : vector<8x512xf32> to vector<8x128xf32>
    %32 = vector.extract_strided_slice %20 {offsets = [0, 384], sizes = [8, 128], strides = [1, 1]} : vector<8x512xf32> to vector<8x128xf32>
    %cst_22 = arith.constant 1.000000e+00 : f32
    %33 = vector.broadcast %cst_22 : f32 to vector<8x128xf32>
    %34 = arith.addf %32, %33 : vector<8x128xf32>
    %cst_23 = arith.constant 5.000000e-01 : f32
    %35 = vector.broadcast %cst_23 : f32 to vector<8x128xf32>
    %36 = arith.mulf %35, %34 : vector<8x128xf32>
    %37 = arith.mulf %30, %13 : vector<8x128xf32>
    %38 = arith.mulf %25, %31 : vector<8x128xf32>
    %39 = arith.addf %37, %38 : vector<8x128xf32>
    %40 = math.tanh %39 : vector<8x128xf32>
    %41 = arith.mulf %36, %40 : vector<8x128xf32>
    %c1_i32 = arith.constant 1 : i32
    %c8_i32_24 = arith.constant 8 : i32
    %42 = arith.muli %c1_i32, %c8_i32_24 : i32
    %43 = tpu.assume_multiple %42, 8 : i32
    %44 = arith.index_cast %43 : i32 to index
    %c0_25 = arith.constant 0 : index
    %45 = vector.load %arg6[%44, %c0_25] : memref<64x512xf32, #tpu.memory_space<vmem>>, vector<8x512xf32>
    %cst_26 = arith.constant dense<0.000000e+00> : vector<8x512xf32>
    %46 = tpu.matmul %41, %11, %cst_26 {dimension_numbers = #tpu.dot_dimension_numbers<[1], [0], [0], [1], [0, 0, 1, 1], [], []>} : vector<8x128xf32>, vector<128x512xf32>, vector<8x512xf32> -> vector<8x512xf32>
    %47 = arith.addf %45, %46 : vector<8x512xf32>
    %48 = math.tanh %47 : vector<8x512xf32>
    %49 = vector.extract_strided_slice %48 {offsets = [0, 0], sizes = [8, 128], strides = [1, 1]} : vector<8x512xf32> to vector<8x128xf32>
    %cst_27 = arith.constant 1.000000e+00 : f32
    %50 = vector.broadcast %cst_27 : f32 to vector<8x128xf32>
    %51 = arith.addf %49, %50 : vector<8x128xf32>
    %cst_28 = arith.constant 5.000000e-01 : f32
    %52 = vector.broadcast %cst_28 : f32 to vector<8x128xf32>
    %53 = arith.mulf %52, %51 : vector<8x128xf32>
    %54 = vector.extract_strided_slice %48 {offsets = [0, 128], sizes = [8, 128], strides = [1, 1]} : vector<8x512xf32> to vector<8x128xf32>
    %cst_29 = arith.constant 1.000000e+00 : f32
    %55 = vector.broadcast %cst_29 : f32 to vector<8x128xf32>
    %56 = arith.addf %54, %55 : vector<8x128xf32>
    %cst_30 = arith.constant 5.000000e-01 : f32
    %57 = vector.broadcast %cst_30 : f32 to vector<8x128xf32>
    %58 = arith.mulf %57, %56 : vector<8x128xf32>
    %59 = vector.extract_strided_slice %48 {offsets = [0, 256], sizes = [8, 128], strides = [1, 1]} : vector<8x512xf32> to vector<8x128xf32>
    %60 = vector.extract_strided_slice %48 {offsets = [0, 384], sizes = [8, 128], strides = [1, 1]} : vector<8x512xf32> to vector<8x128xf32>
    %cst_31 = arith.constant 1.000000e+00 : f32
    %61 = vector.broadcast %cst_31 : f32 to vector<8x128xf32>
    %62 = arith.addf %60, %61 : vector<8x128xf32>
    %cst_32 = arith.constant 5.000000e-01 : f32
    %63 = vector.broadcast %cst_32 : f32 to vector<8x128xf32>
    %64 = arith.mulf %63, %62 : vector<8x128xf32>
    %65 = arith.mulf %58, %39 : vector<8x128xf32>
    %66 = arith.mulf %53, %59 : vector<8x128xf32>
    %67 = arith.addf %65, %66 : vector<8x128xf32>
    %68 = math.tanh %67 : vector<8x128xf32>
    %69 = arith.mulf %64, %68 : vector<8x128xf32>
    %c2_i32 = arith.constant 2 : i32
    %c8_i32_33 = arith.constant 8 : i32
    %70 = arith.muli %c2_i32, %c8_i32_33 : i32
    %71 = tpu.assume_multiple %70, 8 : i32
    %72 = arith.index_cast %71 : i32 to index
    %c0_34 = arith.constant 0 : index
    %73 = vector.load %arg6[%72, %c0_34] : memref<64x512xf32, #tpu.memory_space<vmem>>, vector<8x512xf32>
    %cst_35 = arith.constant dense<0.000000e+00> : vector<8x512xf32>
    %74 = tpu.matmul %69, %11, %cst_35 {dimension_numbers = #tpu.dot_dimension_numbers<[1], [0], [0], [1], [0, 0, 1, 1], [], []>} : vector<8x128xf32>, vector<128x512xf32>, vector<8x512xf32> -> vector<8x512xf32>
    %75 = arith.addf %73, %74 : vector<8x512xf32>
    %76 = math.tanh %75 : vector<8x512xf32>
    %77 = vector.extract_strided_slice %76 {offsets = [0, 0], sizes = [8, 128], strides = [1, 1]} : vector<8x512xf32> to vector<8x128xf32>
    %cst_36 = arith.constant 1.000000e+00 : f32
    %78 = vector.broadcast %cst_36 : f32 to vector<8x128xf32>
    %79 = arith.addf %77, %78 : vector<8x128xf32>
    %cst_37 = arith.constant 5.000000e-01 : f32
    %80 = vector.broadcast %cst_37 : f32 to vector<8x128xf32>
    %81 = arith.mulf %80, %79 : vector<8x128xf32>
    %82 = vector.extract_strided_slice %76 {offsets = [0, 128], sizes = [8, 128], strides = [1, 1]} : vector<8x512xf32> to vector<8x128xf32>
    %cst_38 = arith.constant 1.000000e+00 : f32
    %83 = vector.broadcast %cst_38 : f32 to vector<8x128xf32>
    %84 = arith.addf %82, %83 : vector<8x128xf32>
    %cst_39 = arith.constant 5.000000e-01 : f32
    %85 = vector.broadcast %cst_39 : f32 to vector<8x128xf32>
    %86 = arith.mulf %85, %84 : vector<8x128xf32>
    %87 = vector.extract_strided_slice %76 {offsets = [0, 256], sizes = [8, 128], strides = [1, 1]} : vector<8x512xf32> to vector<8x128xf32>
    %88 = vector.extract_strided_slice %76 {offsets = [0, 384], sizes = [8, 128], strides = [1, 1]} : vector<8x512xf32> to vector<8x128xf32>
    %cst_40 = arith.constant 1.000000e+00 : f32
    %89 = vector.broadcast %cst_40 : f32 to vector<8x128xf32>
    %90 = arith.addf %88, %89 : vector<8x128xf32>
    %cst_41 = arith.constant 5.000000e-01 : f32
    %91 = vector.broadcast %cst_41 : f32 to vector<8x128xf32>
    %92 = arith.mulf %91, %90 : vector<8x128xf32>
    %93 = arith.mulf %86, %67 : vector<8x128xf32>
    %94 = arith.mulf %81, %87 : vector<8x128xf32>
    %95 = arith.addf %93, %94 : vector<8x128xf32>
    %96 = math.tanh %95 : vector<8x128xf32>
    %97 = arith.mulf %92, %96 : vector<8x128xf32>
    %c3_i32 = arith.constant 3 : i32
    %c8_i32_42 = arith.constant 8 : i32
    %98 = arith.muli %c3_i32, %c8_i32_42 : i32
    %99 = tpu.assume_multiple %98, 8 : i32
    %100 = arith.index_cast %99 : i32 to index
    %c0_43 = arith.constant 0 : index
    %101 = vector.load %arg6[%100, %c0_43] : memref<64x512xf32, #tpu.memory_space<vmem>>, vector<8x512xf32>
    %cst_44 = arith.constant dense<0.000000e+00> : vector<8x512xf32>
    %102 = tpu.matmul %97, %11, %cst_44 {dimension_numbers = #tpu.dot_dimension_numbers<[1], [0], [0], [1], [0, 0, 1, 1], [], []>} : vector<8x128xf32>, vector<128x512xf32>, vector<8x512xf32> -> vector<8x512xf32>
    %103 = arith.addf %101, %102 : vector<8x512xf32>
    %104 = math.tanh %103 : vector<8x512xf32>
    %105 = vector.extract_strided_slice %104 {offsets = [0, 0], sizes = [8, 128], strides = [1, 1]} : vector<8x512xf32> to vector<8x128xf32>
    %cst_45 = arith.constant 1.000000e+00 : f32
    %106 = vector.broadcast %cst_45 : f32 to vector<8x128xf32>
    %107 = arith.addf %105, %106 : vector<8x128xf32>
    %cst_46 = arith.constant 5.000000e-01 : f32
    %108 = vector.broadcast %cst_46 : f32 to vector<8x128xf32>
    %109 = arith.mulf %108, %107 : vector<8x128xf32>
    %110 = vector.extract_strided_slice %104 {offsets = [0, 128], sizes = [8, 128], strides = [1, 1]} : vector<8x512xf32> to vector<8x128xf32>
    %cst_47 = arith.constant 1.000000e+00 : f32
    %111 = vector.broadcast %cst_47 : f32 to vector<8x128xf32>
    %112 = arith.addf %110, %111 : vector<8x128xf32>
    %cst_48 = arith.constant 5.000000e-01 : f32
    %113 = vector.broadcast %cst_48 : f32 to vector<8x128xf32>
    %114 = arith.mulf %113, %112 : vector<8x128xf32>
    %115 = vector.extract_strided_slice %104 {offsets = [0, 256], sizes = [8, 128], strides = [1, 1]} : vector<8x512xf32> to vector<8x128xf32>
    %116 = vector.extract_strided_slice %104 {offsets = [0, 384], sizes = [8, 128], strides = [1, 1]} : vector<8x512xf32> to vector<8x128xf32>
    %cst_49 = arith.constant 1.000000e+00 : f32
    %117 = vector.broadcast %cst_49 : f32 to vector<8x128xf32>
    %118 = arith.addf %116, %117 : vector<8x128xf32>
    %cst_50 = arith.constant 5.000000e-01 : f32
    %119 = vector.broadcast %cst_50 : f32 to vector<8x128xf32>
    %120 = arith.mulf %119, %118 : vector<8x128xf32>
    %121 = arith.mulf %114, %95 : vector<8x128xf32>
    %122 = arith.mulf %109, %115 : vector<8x128xf32>
    %123 = arith.addf %121, %122 : vector<8x128xf32>
    %124 = math.tanh %123 : vector<8x128xf32>
    %125 = arith.mulf %120, %124 : vector<8x128xf32>
    %c4_i32 = arith.constant 4 : i32
    %c8_i32_51 = arith.constant 8 : i32
    %126 = arith.muli %c4_i32, %c8_i32_51 : i32
    %127 = tpu.assume_multiple %126, 8 : i32
    %128 = arith.index_cast %127 : i32 to index
    %c0_52 = arith.constant 0 : index
    %129 = vector.load %arg6[%128, %c0_52] : memref<64x512xf32, #tpu.memory_space<vmem>>, vector<8x512xf32>
    %cst_53 = arith.constant dense<0.000000e+00> : vector<8x512xf32>
    %130 = tpu.matmul %125, %11, %cst_53 {dimension_numbers = #tpu.dot_dimension_numbers<[1], [0], [0], [1], [0, 0, 1, 1], [], []>} : vector<8x128xf32>, vector<128x512xf32>, vector<8x512xf32> -> vector<8x512xf32>
    %131 = arith.addf %129, %130 : vector<8x512xf32>
    %132 = math.tanh %131 : vector<8x512xf32>
    %133 = vector.extract_strided_slice %132 {offsets = [0, 0], sizes = [8, 128], strides = [1, 1]} : vector<8x512xf32> to vector<8x128xf32>
    %cst_54 = arith.constant 1.000000e+00 : f32
    %134 = vector.broadcast %cst_54 : f32 to vector<8x128xf32>
    %135 = arith.addf %133, %134 : vector<8x128xf32>
    %cst_55 = arith.constant 5.000000e-01 : f32
    %136 = vector.broadcast %cst_55 : f32 to vector<8x128xf32>
    %137 = arith.mulf %136, %135 : vector<8x128xf32>
    %138 = vector.extract_strided_slice %132 {offsets = [0, 128], sizes = [8, 128], strides = [1, 1]} : vector<8x512xf32> to vector<8x128xf32>
    %cst_56 = arith.constant 1.000000e+00 : f32
    %139 = vector.broadcast %cst_56 : f32 to vector<8x128xf32>
    %140 = arith.addf %138, %139 : vector<8x128xf32>
    %cst_57 = arith.constant 5.000000e-01 : f32
    %141 = vector.broadcast %cst_57 : f32 to vector<8x128xf32>
    %142 = arith.mulf %141, %140 : vector<8x128xf32>
    %143 = vector.extract_strided_slice %132 {offsets = [0, 256], sizes = [8, 128], strides = [1, 1]} : vector<8x512xf32> to vector<8x128xf32>
    %144 = vector.extract_strided_slice %132 {offsets = [0, 384], sizes = [8, 128], strides = [1, 1]} : vector<8x512xf32> to vector<8x128xf32>
    %cst_58 = arith.constant 1.000000e+00 : f32
    %145 = vector.broadcast %cst_58 : f32 to vector<8x128xf32>
    %146 = arith.addf %144, %145 : vector<8x128xf32>
    %cst_59 = arith.constant 5.000000e-01 : f32
    %147 = vector.broadcast %cst_59 : f32 to vector<8x128xf32>
    %148 = arith.mulf %147, %146 : vector<8x128xf32>
    %149 = arith.mulf %142, %123 : vector<8x128xf32>
    %150 = arith.mulf %137, %143 : vector<8x128xf32>
    %151 = arith.addf %149, %150 : vector<8x128xf32>
    %152 = math.tanh %151 : vector<8x128xf32>
    %153 = arith.mulf %148, %152 : vector<8x128xf32>
    %c5_i32 = arith.constant 5 : i32
    %c8_i32_60 = arith.constant 8 : i32
    %154 = arith.muli %c5_i32, %c8_i32_60 : i32
    %155 = tpu.assume_multiple %154, 8 : i32
    %156 = arith.index_cast %155 : i32 to index
    %c0_61 = arith.constant 0 : index
    %157 = vector.load %arg6[%156, %c0_61] : memref<64x512xf32, #tpu.memory_space<vmem>>, vector<8x512xf32>
    %cst_62 = arith.constant dense<0.000000e+00> : vector<8x512xf32>
    %158 = tpu.matmul %153, %11, %cst_62 {dimension_numbers = #tpu.dot_dimension_numbers<[1], [0], [0], [1], [0, 0, 1, 1], [], []>} : vector<8x128xf32>, vector<128x512xf32>, vector<8x512xf32> -> vector<8x512xf32>
    %159 = arith.addf %157, %158 : vector<8x512xf32>
    %160 = math.tanh %159 : vector<8x512xf32>
    %161 = vector.extract_strided_slice %160 {offsets = [0, 0], sizes = [8, 128], strides = [1, 1]} : vector<8x512xf32> to vector<8x128xf32>
    %cst_63 = arith.constant 1.000000e+00 : f32
    %162 = vector.broadcast %cst_63 : f32 to vector<8x128xf32>
    %163 = arith.addf %161, %162 : vector<8x128xf32>
    %cst_64 = arith.constant 5.000000e-01 : f32
    %164 = vector.broadcast %cst_64 : f32 to vector<8x128xf32>
    %165 = arith.mulf %164, %163 : vector<8x128xf32>
    %166 = vector.extract_strided_slice %160 {offsets = [0, 128], sizes = [8, 128], strides = [1, 1]} : vector<8x512xf32> to vector<8x128xf32>
    %cst_65 = arith.constant 1.000000e+00 : f32
    %167 = vector.broadcast %cst_65 : f32 to vector<8x128xf32>
    %168 = arith.addf %166, %167 : vector<8x128xf32>
    %cst_66 = arith.constant 5.000000e-01 : f32
    %169 = vector.broadcast %cst_66 : f32 to vector<8x128xf32>
    %170 = arith.mulf %169, %168 : vector<8x128xf32>
    %171 = vector.extract_strided_slice %160 {offsets = [0, 256], sizes = [8, 128], strides = [1, 1]} : vector<8x512xf32> to vector<8x128xf32>
    %172 = vector.extract_strided_slice %160 {offsets = [0, 384], sizes = [8, 128], strides = [1, 1]} : vector<8x512xf32> to vector<8x128xf32>
    %cst_67 = arith.constant 1.000000e+00 : f32
    %173 = vector.broadcast %cst_67 : f32 to vector<8x128xf32>
    %174 = arith.addf %172, %173 : vector<8x128xf32>
    %cst_68 = arith.constant 5.000000e-01 : f32
    %175 = vector.broadcast %cst_68 : f32 to vector<8x128xf32>
    %176 = arith.mulf %175, %174 : vector<8x128xf32>
    %177 = arith.mulf %170, %151 : vector<8x128xf32>
    %178 = arith.mulf %165, %171 : vector<8x128xf32>
    %179 = arith.addf %177, %178 : vector<8x128xf32>
    %180 = math.tanh %179 : vector<8x128xf32>
    %181 = arith.mulf %176, %180 : vector<8x128xf32>
    %c6_i32 = arith.constant 6 : i32
    %c8_i32_69 = arith.constant 8 : i32
    %182 = arith.muli %c6_i32, %c8_i32_69 : i32
    %183 = tpu.assume_multiple %182, 8 : i32
    %184 = arith.index_cast %183 : i32 to index
    %c0_70 = arith.constant 0 : index
    %185 = vector.load %arg6[%184, %c0_70] : memref<64x512xf32, #tpu.memory_space<vmem>>, vector<8x512xf32>
    %cst_71 = arith.constant dense<0.000000e+00> : vector<8x512xf32>
    %186 = tpu.matmul %181, %11, %cst_71 {dimension_numbers = #tpu.dot_dimension_numbers<[1], [0], [0], [1], [0, 0, 1, 1], [], []>} : vector<8x128xf32>, vector<128x512xf32>, vector<8x512xf32> -> vector<8x512xf32>
    %187 = arith.addf %185, %186 : vector<8x512xf32>
    %188 = math.tanh %187 : vector<8x512xf32>
    %189 = vector.extract_strided_slice %188 {offsets = [0, 0], sizes = [8, 128], strides = [1, 1]} : vector<8x512xf32> to vector<8x128xf32>
    %cst_72 = arith.constant 1.000000e+00 : f32
    %190 = vector.broadcast %cst_72 : f32 to vector<8x128xf32>
    %191 = arith.addf %189, %190 : vector<8x128xf32>
    %cst_73 = arith.constant 5.000000e-01 : f32
    %192 = vector.broadcast %cst_73 : f32 to vector<8x128xf32>
    %193 = arith.mulf %192, %191 : vector<8x128xf32>
    %194 = vector.extract_strided_slice %188 {offsets = [0, 128], sizes = [8, 128], strides = [1, 1]} : vector<8x512xf32> to vector<8x128xf32>
    %cst_74 = arith.constant 1.000000e+00 : f32
    %195 = vector.broadcast %cst_74 : f32 to vector<8x128xf32>
    %196 = arith.addf %194, %195 : vector<8x128xf32>
    %cst_75 = arith.constant 5.000000e-01 : f32
    %197 = vector.broadcast %cst_75 : f32 to vector<8x128xf32>
    %198 = arith.mulf %197, %196 : vector<8x128xf32>
    %199 = vector.extract_strided_slice %188 {offsets = [0, 256], sizes = [8, 128], strides = [1, 1]} : vector<8x512xf32> to vector<8x128xf32>
    %200 = vector.extract_strided_slice %188 {offsets = [0, 384], sizes = [8, 128], strides = [1, 1]} : vector<8x512xf32> to vector<8x128xf32>
    %cst_76 = arith.constant 1.000000e+00 : f32
    %201 = vector.broadcast %cst_76 : f32 to vector<8x128xf32>
    %202 = arith.addf %200, %201 : vector<8x128xf32>
    %cst_77 = arith.constant 5.000000e-01 : f32
    %203 = vector.broadcast %cst_77 : f32 to vector<8x128xf32>
    %204 = arith.mulf %203, %202 : vector<8x128xf32>
    %205 = arith.mulf %198, %179 : vector<8x128xf32>
    %206 = arith.mulf %193, %199 : vector<8x128xf32>
    %207 = arith.addf %205, %206 : vector<8x128xf32>
    %208 = math.tanh %207 : vector<8x128xf32>
    %209 = arith.mulf %204, %208 : vector<8x128xf32>
    %c7_i32 = arith.constant 7 : i32
    %c8_i32_78 = arith.constant 8 : i32
    %210 = arith.muli %c7_i32, %c8_i32_78 : i32
    %211 = tpu.assume_multiple %210, 8 : i32
    %212 = arith.index_cast %211 : i32 to index
    %c0_79 = arith.constant 0 : index
    %213 = vector.load %arg6[%212, %c0_79] : memref<64x512xf32, #tpu.memory_space<vmem>>, vector<8x512xf32>
    %cst_80 = arith.constant dense<0.000000e+00> : vector<8x512xf32>
    %214 = tpu.matmul %209, %11, %cst_80 {dimension_numbers = #tpu.dot_dimension_numbers<[1], [0], [0], [1], [0, 0, 1, 1], [], []>} : vector<8x128xf32>, vector<128x512xf32>, vector<8x512xf32> -> vector<8x512xf32>
    %215 = arith.addf %213, %214 : vector<8x512xf32>
    %216 = math.tanh %215 : vector<8x512xf32>
    %217 = vector.extract_strided_slice %216 {offsets = [0, 0], sizes = [8, 128], strides = [1, 1]} : vector<8x512xf32> to vector<8x128xf32>
    %cst_81 = arith.constant 1.000000e+00 : f32
    %218 = vector.broadcast %cst_81 : f32 to vector<8x128xf32>
    %219 = arith.addf %217, %218 : vector<8x128xf32>
    %cst_82 = arith.constant 5.000000e-01 : f32
    %220 = vector.broadcast %cst_82 : f32 to vector<8x128xf32>
    %221 = arith.mulf %220, %219 : vector<8x128xf32>
    %222 = vector.extract_strided_slice %216 {offsets = [0, 128], sizes = [8, 128], strides = [1, 1]} : vector<8x512xf32> to vector<8x128xf32>
    %cst_83 = arith.constant 1.000000e+00 : f32
    %223 = vector.broadcast %cst_83 : f32 to vector<8x128xf32>
    %224 = arith.addf %222, %223 : vector<8x128xf32>
    %cst_84 = arith.constant 5.000000e-01 : f32
    %225 = vector.broadcast %cst_84 : f32 to vector<8x128xf32>
    %226 = arith.mulf %225, %224 : vector<8x128xf32>
    %227 = vector.extract_strided_slice %216 {offsets = [0, 256], sizes = [8, 128], strides = [1, 1]} : vector<8x512xf32> to vector<8x128xf32>
    %228 = vector.extract_strided_slice %216 {offsets = [0, 384], sizes = [8, 128], strides = [1, 1]} : vector<8x512xf32> to vector<8x128xf32>
    %cst_85 = arith.constant 1.000000e+00 : f32
    %229 = vector.broadcast %cst_85 : f32 to vector<8x128xf32>
    %230 = arith.addf %228, %229 : vector<8x128xf32>
    %cst_86 = arith.constant 5.000000e-01 : f32
    %231 = vector.broadcast %cst_86 : f32 to vector<8x128xf32>
    %232 = arith.mulf %231, %230 : vector<8x128xf32>
    %233 = arith.mulf %226, %207 : vector<8x128xf32>
    %234 = arith.mulf %221, %227 : vector<8x128xf32>
    %235 = arith.addf %233, %234 : vector<8x128xf32>
    %236 = math.tanh %235 : vector<8x128xf32>
    %237 = arith.mulf %232, %236 : vector<8x128xf32>
    %c8_i32_87 = arith.constant 8 : i32
    %c0_88 = arith.constant 0 : index
    %c0_89 = arith.constant 0 : index
    %238 = vector.load %arg7[%c0_88, %c0_89] : memref<8x128xf32, #tpu.memory_space<vmem>>, vector<8x128xf32>
    tpu.vector_store %arg7[%c0_88, %c0_89], %237 {strides = array<i32>} : memref<8x128xf32, #tpu.memory_space<vmem>>, vector<8x128xf32>,
    %c0_90 = arith.constant 0 : index
    %c0_91 = arith.constant 0 : index
    %239 = vector.load %arg8[%c0_90, %c0_91] : memref<8x128xf32, #tpu.memory_space<vmem>>, vector<8x128xf32>
    tpu.vector_store %arg8[%c0_90, %c0_91], %235 {strides = array<i32>} : memref<8x128xf32, #tpu.memory_space<vmem>>, vector<8x128xf32>,
    %c0_i32_92 = arith.constant 0 : i32
    %240 = arith.cmpi eq, %arg0, %c0_i32_92 : i32
    %241 = arith.extui %240 : i1 to i32
    %c0_i32_93 = arith.constant 0 : i32
    %242 = arith.cmpi ne, %241, %c0_i32_93 : i32
    scf.if %242 {
      %c0_94 = arith.constant 0 : index
      %c0_95 = arith.constant 0 : index
      %243 = vector.load %arg5[%c0_94, %c0_95] : memref<8x128xf32, #tpu.memory_space<vmem>>, vector<8x128xf32>
      tpu.vector_store %arg5[%c0_94, %c0_95], %237 {strides = array<i32>} : memref<8x128xf32, #tpu.memory_space<vmem>>, vector<8x128xf32>,
    } else {
    }
    return
  }
  func.func @transform_0(%arg0: i32) -> (i32, i32, i32) {
    %c0_i32 = arith.constant 0 : i32
    %c0_i32_0 = arith.constant 0 : i32
    %c0_i32_1 = arith.constant 0 : i32
    return %arg0, %c0_i32, %c0_i32_0 : i32, i32, i32
  }
  func.func @transform_1(%arg0: i32) -> (i32, i32) {
    %c0_i32 = arith.constant 0 : i32
    %c0_i32_0 = arith.constant 0 : i32
    %c0_i32_1 = arith.constant 0 : i32
    return %c0_i32, %c0_i32_0 : i32, i32
  }
  func.func @transform_2(%arg0: i32) -> (i32, i32) {
    %c0_i32 = arith.constant 0 : i32
    %c0_i32_0 = arith.constant 0 : i32
    %c0_i32_1 = arith.constant 0 : i32
    return %c0_i32, %c0_i32_0 : i32, i32
  }
  func.func @transform_3(%arg0: i32) -> (i32, i32) {
    %c0_i32 = arith.constant 0 : i32
    %c0_i32_0 = arith.constant 0 : i32
    %c0_i32_1 = arith.constant 0 : i32
    return %c0_i32, %c0_i32_0 : i32, i32
  }
  func.func @transform_4(%arg0: i32) -> (i32, i32) {
    %c0_i32 = arith.constant 0 : i32
    %c0_i32_0 = arith.constant 0 : i32
    %c0_i32_1 = arith.constant 0 : i32
    return %c0_i32, %c0_i32_0 : i32, i32
  }
}

</mosaic_0001>

<bundles_post_ra>
// kernel: tpu_custom_call.1
= control target key start
LH: loop header
LB: loop body
LE: loop exit
PB: predicated region body
PF: predicated region fallthrough
CT: control target
= control target key end

     0   :  { %9 = vsyncpa [#allocation6], 0  ;;  %s3065_s0 = inlined_call_operand.vmem [shape: f32[1,64,16], index: 0, kind: input, shape index: {}]   ;;  %s3066_s1 = inlined_call_operand.vmem [shape: f32[16,512], index: 1, kind: input, shape index: {}]   ;;  %s3067_s2 = inlined_call_operand.hbm [shape: f32[128,512], index: 2, kind: input, shape index: {}]   ;;  %s3068_s3 = inlined_call_operand.vmem [shape: f32[1,512], index: 3, kind: input, shape index: {}]   ;;  %s3069_s4 = inlined_call_operand.hbm [shape: f32[8,128], index: 4, kind: output, shape index: {}]  }
   0x1   :  { %10 = vsyncpa [#allocation7], 0  ;;  %s2530_s15 = smov [#allocation5]   ;;  %s2482_s19 = scalar_lea.hbm %s3067_s2, 8192 }
   0x2   :  { %s20_s16 = sshll.u32 %s2530_s15, 4  ;;  %p2483_p0 = scmp.ne.s32.totalorder %s3067_s2, %s2482_s19  ;;  %s21_s16 = int_to_ptr.vmem [resolvable:$true] %s20_s16 }
   0x3   :  { %p2486_p1 = scmp.lt.u32.totalorder %s2482_s19, %s3067_s2 }
   0x5   :  { %p2488_p2 = pnand %p2486_p1, %p2483_p0 }
   0x7   :  { %2491 = shalt.err (!%p2488_p2)
}
   0x8   :  { %s2492_s24 = scalar_lea.vmem %s21_s16, 8192  ;;  %p2497_p4 = scmp.lt.s32.totalorder %s21_s16, %s21_s16 }
   0x9   :  { %p2493_p3 = scmp.ne.s32.totalorder %s21_s16, %s2492_s24  ;;  %p2498_p5 = scmp.lt.s32.totalorder %s2492_s24, %s2492_s24 }
   0xb   :  { %p2499_p6 = por %p2498_p5, %p2497_p4 }
   0xd   :  { %p2500_p7 = pnand %p2499_p6, %p2493_p3 }
   0xf   :  { %2503 = shalt.err (!%p2500_p7)
}
  0x10   :  { %s2531_s25 = smov 512   ;;  %s2532_s26 = smov 32  }
  0x11   :  { %26 = dma.hbm_to_vmem [thread:$0]  %s3067_s2, 8192, %s21_s16, [#allocation6], %s2531_s25, %s2531_s25, %s2532_s26  }
  0x12   :  { %2526 = dma.done.wait [#allocation6], 8192  }
  0x13   :  { %2527 = vsyncadd [#allocation6], 4294959104  ;;  %v2533_v0 = vmov 0.0   ;;  %v47_v1 = vld [vmem:[%s3066_s1 + $0x8] sm:$0xff]  ;;  %v49_v3 = vld [vmem:[%s3066_s1 + $0x18] sm:$0xff]  ;;  %vm76_vm0 = vcmask 130048  }
  0x14   :  { %165 = vmatprep.mubr.f32.mxu0 %v2533_v0  ;;  %278 = vmatprep.mubr.f32.mxu1 %v2533_v0  ;;  %v51_v2 = vld [vmem:[%s3066_s1 + $0x28] sm:$0xff]  ;;  %v53_v5 = vld [vmem:[%s3066_s1 + $0x38] sm:$0xff]  ;;  %v46_v6 = vld [vmem:[%s3066_s1] sm:$0xff] }
  0x15   :  { %v1813_v4 = vpack.c.bf16 %v51_v2, %v47_v1  ;;  %v50_v7 = vld [vmem:[%s3066_s1 + $0x20] sm:$0xff]  ;;  %v1817_v8 = vpack.c.bf16 %v53_v5, %v49_v3  ;;  %v48_v10 = vld [vmem:[%s3066_s1 + $0x10] sm:$0xff]  ;;  %v360_v14 = vld [vmem:[#allocation5 + $0x8] sm:$0xff] }
  0x16   :  { %v1815_v9 = vpack.c.bf16 %v50_v7, %v46_v6  ;;  %v52_v11 = vld [vmem:[%s3066_s1 + $0x30] sm:$0xff]  ;;  %v38_v12 = vld [vmem:[%s3065_s0] sm:$0xff]  ;;  %v364_v15 = vld [vmem:[#allocation5 + $0x28] sm:$0xff] }
  0x17   :  { %1814 = vmatprep.subr.bf16.mxu0 %v1813_v4  ;;  %v1819_v13 = vpack.c.bf16 %v52_v11, %v48_v10  ;;  %v362_v16 = vld [vmem:[#allocation5 + $0x18] sm:$0xff]  ;;  %1818 = vmatprep.subr.bf16.mxu1 %v1817_v8  ;;  %v2601_v17 = vpack.c.bf16 %v364_v15, %v360_v14  ;;  %v359_v19 = vld [vmem:[#allocation5] sm:$0xff]  ;;  %v361_v23 = vld [vmem:[#allocation5 + $0x10] sm:$0xff] }
  0x18   :  { %1816 = vmatpush1.bf16.msra.mxu0 %v1815_v9  ;;  %v366_v18 = vld [vmem:[#allocation5 + $0x38] sm:$0xff]  ;;  %v363_v20 = vld [vmem:[#allocation5 + $0x20] sm:$0xff]  ;;  %v365_v24 = vld [vmem:[#allocation5 + $0x30] sm:$0xff] }
  0x19   :  { %1820 = vmatpush1.bf16.msra.mxu1 %v1819_v13  ;;  %v2603_v21 = vpack.c.bf16 %v366_v18, %v362_v16  ;;  %v2605_v22 = vpack.c.bf16 %v363_v20, %v359_v19  ;;  %1822 = vmatprep.subr.bf16.mxu0 %v2601_v17  ;;  %v2608_v25 = vpack.c.bf16 %v365_v24, %v361_v23  ;;  %v368_v26 = vld [vmem:[#allocation5 + $0x48] sm:$0xff]  ;;  %v370_v28 = vld [vmem:[#allocation5 + $0x58] sm:$0xff]  ;;  %v367_v31 = vld [vmem:[#allocation5 + $0x40] sm:$0xff] }
  0x1a   :  { %v372_v27 = vld [vmem:[#allocation5 + $0x68] sm:$0xff]  ;;  %v374_v30 = vld [vmem:[#allocation5 + $0x78] sm:$0xff]  ;;  %v371_v32 = vld [vmem:[#allocation5 + $0x60] sm:$0xff] }
  0x1b   :  { %1797 = vmatmul.mubr.msk.f32.vlgmr.msra.gmra.mrb[0].mxu0 %vm76_vm0, %v38_v12  ;;  %1854 = vmatprep.subr.bf16.mxu1 %v2603_v21  ;;  %v2612_v29 = vpack.c.bf16 %v372_v27, %v368_v26  ;;  %v39_v33 = vld [vmem:[%s3065_s0 + $0x8] sm:$0xff]  ;;  %v2619_v34 = vpack.c.bf16 %v374_v30, %v370_v28  ;;  %v2621_v35 = vpack.c.bf16 %v371_v32, %v367_v31  ;;  %v369_v36 = vld [vmem:[#allocation5 + $0x50] sm:$0xff]  ;;  %v378_v41 = vld [vmem:[#allocation5 + $0x98] sm:$0xff] }
  0x1c   :  { %1805 = vmatmul.mubr.msk.f32.vlgmr.msra.gmra.mrb[0].mxu1 %vm76_vm0, %v38_v12  ;;  %1824 = vmatpush1.bf16.msra.mxu0 %v2605_v22  ;;  %v373_v37 = vld [vmem:[#allocation5 + $0x70] sm:$0xff]  ;;  %v376_v39 = vld [vmem:[#allocation5 + $0x88] sm:$0xff]  ;;  %v382_v43 = vld [vmem:[#allocation5 + $0xb8] sm:$0xff] }
  0x1d   :  { %1856 = vmatpush1.bf16.msra.mxu1 %v2608_v25  ;;  %171 = vmatprep.mubr.f32.mxu0 %v2533_v0  ;;  %v2625_v38 = vpack.c.bf16 %v373_v37, %v369_v36  ;;  %v380_v40 = vld [vmem:[#allocation5 + $0xa8] sm:$0xff]  ;;  %v375_v44 = vld [vmem:[#allocation5 + $0x80] sm:$0xff]  ;;  %v40_v46 = vld [vmem:[%s3065_s0 + $0x10] sm:$0xff]  ;;  %v2636_v47 = vpack.c.bf16 %v382_v43, %v378_v41 }
  0x1e   :  { %284 = vmatprep.mubr.f32.mxu1 %v2533_v0  ;;  %1826 = vmatprep.subr.bf16.mxu0 %v2612_v29  ;;  %v2629_v42 = vpack.c.bf16 %v380_v40, %v376_v39  ;;  %v379_v45 = vld [vmem:[#allocation5 + $0xa0] sm:$0xff]  ;;  %v377_v48 = vld [vmem:[#allocation5 + $0x90] sm:$0xff]  ;;  %v384_v51 = vld [vmem:[#allocation5 + $0xc8] sm:$0xff] }
  0x1f   :  { %1798 = vmatmul.mubr.msk.f32.gmra.mrb[2].mxu0 %vm76_vm0, %v39_v33  ;;  %1858 = vmatprep.subr.bf16.mxu1 %v2619_v34  ;;  %v381_v49 = vld [vmem:[#allocation5 + $0xb0] sm:$0xff]  ;;  %v2640_v50 = vpack.c.bf16 %v379_v45, %v375_v44  ;;  %v388_v52 = vld [vmem:[#allocation5 + $0xe8] sm:$0xff]  ;;  %v386_v53 = vld [vmem:[#allocation5 + $0xd8] sm:$0xff] }
  0x20   :  { %1806 = vmatmul.mubr.msk.f32.gmra.mrb[2].mxu1 %vm76_vm0, %v39_v33  ;;  %1828 = vmatpush1.bf16.msra.mxu0 %v2621_v35  ;;  %v2644_v54 = vpack.c.bf16 %v381_v49, %v377_v48  ;;  %v390_v55 = vld [vmem:[#allocation5 + $0xf8] sm:$0xff]  ;;  %v383_v56 = vld [vmem:[#allocation5 + $0xc0] sm:$0xff]  ;;  %v2648_v58 = vpack.c.bf16 %v388_v52, %v384_v51  ;;  %v385_v59 = vld [vmem:[#allocation5 + $0xd0] sm:$0xff] }
  0x21   :  { %1860 = vmatpush1.bf16.msra.mxu1 %v2625_v38  ;;  %177 = vmatprep.mubr.f32.mxu0 %v2533_v0  ;;  %v387_v57 = vld [vmem:[#allocation5 + $0xe0] sm:$0xff]  ;;  %v389_v60 = vld [vmem:[#allocation5 + $0xf0] sm:$0xff]  ;;  %v2652_v61 = vpack.c.bf16 %v390_v55, %v386_v53  ;;  %v392_v62 = vld [vmem:[#allocation5 + $0x108] sm:$0xff] }
  0x22   :  { %290 = vmatprep.mubr.f32.mxu1 %v2533_v0  ;;  %1830 = vmatprep.subr.bf16.mxu0 %v2629_v42  ;;  %v396_v63 = vld [vmem:[#allocation5 + $0x128] sm:$0xff]  ;;  %v41_v1 = vld [vmem:[%s3065_s0 + $0x18] sm:$0xff]  ;;  %v2659_v2 = vpack.c.bf16 %v387_v57, %v383_v56  ;;  %v2663_v5 = vpack.c.bf16 %v389_v60, %v385_v59  ;;  %v391_v6 = vld [vmem:[#allocation5 + $0x100] sm:$0xff] }
  0x23   :  { %1799 = vmatmul.mubr.msk.f32.gmra.mrb[4].mxu0 %vm76_vm0, %v40_v46  ;;  %1862 = vmatprep.subr.bf16.mxu1 %v2636_v47  ;;  %v394_v3 = vld [vmem:[#allocation5 + $0x118] sm:$0xff]  ;;  %v395_v7 = vld [vmem:[#allocation5 + $0x120] sm:$0xff]  ;;  %v2667_v8 = vpack.c.bf16 %v396_v63, %v392_v62  ;;  %v393_v9 = vld [vmem:[#allocation5 + $0x110] sm:$0xff] }
  0x24   :  { %1807 = vmatmul.mubr.msk.f32.gmra.mrb[4].mxu1 %vm76_vm0, %v40_v46  ;;  %1832 = vmatpush1.bf16.msra.mxu0 %v2640_v50  ;;  %v398_v4 = vld [vmem:[#allocation5 + $0x138] sm:$0xff]  ;;  %v397_v10 = vld [vmem:[#allocation5 + $0x130] sm:$0xff]  ;;  %v400_v12 = vld [vmem:[#allocation5 + $0x148] sm:$0xff]  ;;  %v2678_v15 = vpack.c.bf16 %v395_v7, %v391_v6  ;;  %v56_v7 = vlaneseq }
  0x25   :  { %1864 = vmatpush1.bf16.msra.mxu1 %v2644_v54  ;;  %183 = vmatprep.mubr.f32.mxu0 %v2533_v0  ;;  %v2671_v11 = vpack.c.bf16 %v398_v4, %v394_v3  ;;  %v404_v13 = vld [vmem:[#allocation5 + $0x168] sm:$0xff]  ;;  %v42_v14 = vld [vmem:[%s3065_s0 + $0x20] sm:$0xff]  ;;  %v402_v16 = vld [vmem:[#allocation5 + $0x158] sm:$0xff]  ;;  %v2682_v19 = vpack.c.bf16 %v397_v10, %v393_v9 }
  0x26   :  { %296 = vmatprep.mubr.f32.mxu1 %v2533_v0  ;;  %1834 = vmatprep.subr.bf16.mxu0 %v2648_v58  ;;  %v406_v18 = vld [vmem:[#allocation5 + $0x178] sm:$0xff]  ;;  %v399_v20 = vld [vmem:[#allocation5 + $0x140] sm:$0xff]  ;;  %v2686_v24 = vpack.c.bf16 %v404_v13, %v400_v12  ;;  %v401_v26 = vld [vmem:[#allocation5 + $0x150] sm:$0xff]  ;;  %v57_v9 = vshrl.u32 %v56_v7, 7 }
  0x27   :  { %1800 = vmatmul.mubr.msk.f32.gmra.mrb[6].mxu0 %vm76_vm0, %v41_v1  ;;  %1866 = vmatprep.subr.bf16.mxu1 %v2652_v61  ;;  %v403_v23 = vld [vmem:[#allocation5 + $0x160] sm:$0xff]  ;;  %v405_v27 = vld [vmem:[#allocation5 + $0x170] sm:$0xff]  ;;  %v2690_v28 = vpack.c.bf16 %v406_v18, %v402_v16  ;;  %v408_v30 = vld [vmem:[#allocation5 + $0x188] sm:$0xff] }
  0x28   :  { %1808 = vmatmul.mubr.msk.f32.gmra.mrb[6].mxu1 %vm76_vm0, %v41_v1  ;;  %1836 = vmatpush1.bf16.msra.mxu0 %v2659_v2  ;;  %v412_v31 = vld [vmem:[#allocation5 + $0x1a8] sm:$0xff]  ;;  %v2697_v33 = vpack.c.bf16 %v403_v23, %v399_v20  ;;  %v410_v36 = vld [vmem:[#allocation5 + $0x198] sm:$0xff]  ;;  %v2701_v39 = vpack.c.bf16 %v405_v27, %v401_v26  ;;  %v407_v40 = vld [vmem:[#allocation5 + $0x180] sm:$0xff]  ;;  %v58_v10 = vsub.s32 0, %v57_v9  ;;  %v62_v13 = vsub.s32 1, %v57_v9 }
  0x29   :  { %1868 = vmatpush1.bf16.msra.mxu1 %v2663_v5  ;;  %189 = vmatprep.mubr.f32.mxu0 %v2533_v0  ;;  %v43_v32 = vld [vmem:[%s3065_s0 + $0x28] sm:$0xff]  ;;  %v414_v37 = vld [vmem:[#allocation5 + $0x1b8] sm:$0xff]  ;;  %v411_v41 = vld [vmem:[#allocation5 + $0x1a0] sm:$0xff]  ;;  %v2705_v43 = vpack.c.bf16 %v412_v31, %v408_v30 }
  0x2a   :  { %302 = vmatprep.mubr.f32.mxu1 %v2533_v0  ;;  %1838 = vmatprep.subr.bf16.mxu0 %v2667_v8  ;;  %v409_v44 = vld [vmem:[#allocation5 + $0x190] sm:$0xff]  ;;  %v2709_v46 = vpack.c.bf16 %v414_v37, %v410_v36  ;;  %v416_v48 = vld [vmem:[#allocation5 + $0x1c8] sm:$0xff]  ;;  %v2716_v52 = vpack.c.bf16 %v411_v41, %v407_v40  ;;  %v418_v53 = vld [vmem:[#allocation5 + $0x1d8] sm:$0xff]  ;;  %v70_v37 = vsub.s32 3, %v57_v9 }
  0x2b   :  { %1801 = vmatmul.mubr.msk.f32.gmra.mrb[8].mxu0 %vm76_vm0, %v42_v14  ;;  %1870 = vmatprep.subr.bf16.mxu1 %v2671_v11  ;;  %v413_v45 = vld [vmem:[#allocation5 + $0x1b0] sm:$0xff]  ;;  %v420_v49 = vld [vmem:[#allocation5 + $0x1e8] sm:$0xff]  ;;  %v422_v55 = vld [vmem:[#allocation5 + $0x1f8] sm:$0xff] }
  0x2c   :  { %1809 = vmatmul.mubr.msk.f32.gmra.mrb[8].mxu1 %vm76_vm0, %v42_v14  ;;  %1840 = vmatpush1.bf16.msra.mxu0 %v2678_v15  ;;  %v44_v51 = vld [vmem:[%s3065_s0 + $0x30] sm:$0xff]  ;;  %v2720_v56 = vpack.c.bf16 %v413_v45, %v409_v44  ;;  %v415_v57 = vld [vmem:[#allocation5 + $0x1c0] sm:$0xff]  ;;  %v2724_v60 = vpack.c.bf16 %v420_v49, %v416_v48  ;;  %v2728_v1 = vpack.c.bf16 %v422_v55, %v418_v53  ;;  %v45_v3 = vld [vmem:[%s3065_s0 + $0x38] sm:$0xff]  ;;  %v66_v14 = vsub.s32 2, %v57_v9 }
  0x2d   :  { %1872 = vmatpush1.bf16.msra.mxu1 %v2682_v19  ;;  %195 = vmatprep.mubr.f32.mxu0 %v2533_v0  ;;  %v419_v59 = vld [vmem:[#allocation5 + $0x1e0] sm:$0xff]  ;;  %v417_v62 = vld [vmem:[#allocation5 + $0x1d0] sm:$0xff] }
  0x2e   :  { %308 = vmatprep.mubr.f32.mxu1 %v2533_v0  ;;  %1842 = vmatprep.subr.bf16.mxu0 %v2686_v24  ;;  %v421_v63 = vld [vmem:[#allocation5 + $0x1f0] sm:$0xff]  ;;  %v2735_v4 = vpack.c.bf16 %v419_v59, %v415_v57  ;;  %v54_v12 = vld [vmem:[%s3068_s3] sm:$0xf]  ;;  %s2534_s3 = smov [#allocation8]  }
  0x2f   :  { %1802 = vmatmul.mubr.msk.f32.gmra.mrb[10].mxu0 %vm76_vm0, %v43_v32  ;;  %1874 = vmatprep.subr.bf16.mxu1 %v2690_v28  ;;  %v2739_v6 = vpack.c.bf16 %v421_v63, %v417_v62  ;;  %v2791_v16 = vrot.slane %v54_v12, %v58_v10  ;;  %v2793_v18 = vrot.slane %v54_v12, %v62_v13  ;;  %s1781_s8 = sshll.u32 %s2534_s3, 4  ;;  %s1782_s8 = int_to_ptr.vmem [resolvable:$true] %s1781_s8 }
  0x30   :  { %1810 = vmatmul.mubr.msk.f32.gmra.mrb[10].mxu1 %vm76_vm0, %v43_v32  ;;  %1844 = vmatpush1.bf16.msra.mxu0 %v2697_v33  ;;  %v2795_v20 = vrot.slane %v54_v12, %v66_v14  ;;  %v2800_v40 = vrot.slane %v54_v12, %v70_v37  ;;  %s2504_s2 = scalar_lea.vmem %s1782_s8, 128  ;;  %p2509_p9 = scmp.lt.s32.totalorder %s1782_s8, %s1782_s8 }
  0x31   :  { %1876 = vmatpush1.bf16.msra.mxu1 %v2701_v39  ;;  %201 = vmatprep.mubr.f32.mxu0 %v2533_v0  ;;  %p2505_p8 = scmp.ne.s32.totalorder %s1782_s8, %s2504_s2  ;;  %p2510_p10 = scmp.lt.s32.totalorder %s2504_s2, %s2504_s2 }
  0x32   :  { %314 = vmatprep.mubr.f32.mxu1 %v2533_v0  ;;  %1846 = vmatprep.subr.bf16.mxu0 %v2705_v43 }
  0x33   :  { %1803 = vmatmul.mubr.msk.f32.gmra.mrb[12].mxu0 %vm76_vm0, %v44_v51  ;;  %1878 = vmatprep.subr.bf16.mxu1 %v2709_v46  ;;  %p2511_p11 = por %p2510_p10, %p2509_p9 }
  0x34   :  { %1811 = vmatmul.mubr.msk.f32.gmra.mrb[12].mxu1 %vm76_vm0, %v44_v51  ;;  %1848 = vmatpush1.bf16.msra.mxu0 %v2716_v52 }
  0x35   :  { %1880 = vmatpush1.bf16.msra.mxu1 %v2720_v56  ;;  %207 = vmatprep.mubr.f32.mxu0 %v2533_v0  ;;  %p2512_p12 = pnand %p2511_p11, %p2505_p8 }
  0x36   :  { %320 = vmatprep.mubr.f32.mxu1 %v2533_v0  ;;  %1850 = vmatprep.subr.bf16.mxu0 %v2724_v60 }
  0x37   :  { %1804 = vmatmul.mubr.msk.f32.gmra.mrb[14].mxu0 %vm76_vm0, %v45_v3  ;;  %1882 = vmatprep.subr.bf16.mxu1 %v2728_v1 }
  0x38   :  { %1812 = vmatmul.mubr.msk.f32.gmra.mrb[14].mxu1 %vm76_vm0, %v45_v3  ;;  %1852 = vmatpush1.bf16.msra.mxu0 %v2735_v4 }
  0x39   :  { %1884 = vmatpush1.bf16.msra.mxu1 %v2739_v6  ;;  %496 = vmatprep.mubr.f32.mxu0 %v2533_v0 }
  0x3a   :  { %567 = vmatprep.mubr.f32.mxu1 %v2533_v0  ;;  %1886 = vmatprep.subr.bf16.mxu0 %v2601_v17 }
  0x3b   :  { %497 = vmatmul.mubr.f32.vlgmr.msra.gmra.mrb[0].mxu0 %v2533_v0  ;;  %1918 = vmatprep.subr.bf16.mxu1 %v2603_v21 }
  0x3c   :  { %568 = vmatmul.mubr.f32.vlgmr.msra.gmra.mrb[0].mxu1 %v2533_v0  ;;  %1888 = vmatpush1.bf16.msra.mxu0 %v2605_v22 }
  0x3d   :  { %1920 = vmatpush1.bf16.msra.mxu1 %v2608_v25  ;;  %1890 = vmatprep.subr.bf16.mxu0 %v2612_v29 }
  0x3e   :  { %1922 = vmatprep.subr.bf16.mxu1 %v2619_v34  ;;  %664 = vmatprep.mubr.f32.mxu0 %v2533_v0 }
  0x3f   :  { %735 = vmatprep.mubr.f32.mxu1 %v2533_v0 }
  0x40   :  { %1892 = vmatpush1.bf16.msra.mxu0 %v2621_v35 }
  0x41   :  { %1924 = vmatpush1.bf16.msra.mxu1 %v2625_v38  ;;  %1894 = vmatprep.subr.bf16.mxu0 %v2629_v42 }
  0x42   :  { %1926 = vmatprep.subr.bf16.mxu1 %v2636_v47 }
  0x44   :  { %1896 = vmatpush1.bf16.msra.mxu0 %v2640_v50 }
  0x45   :  { %1928 = vmatpush1.bf16.msra.mxu1 %v2644_v54  ;;  %1898 = vmatprep.subr.bf16.mxu0 %v2648_v58 }
  0x46   :  { %1930 = vmatprep.subr.bf16.mxu1 %v2652_v61 }
  0x48   :  { %1900 = vmatpush1.bf16.msra.mxu0 %v2659_v2 }
  0x49   :  { %1932 = vmatpush1.bf16.msra.mxu1 %v2663_v5  ;;  %1902 = vmatprep.subr.bf16.mxu0 %v2667_v8 }
  0x4a   :  { %1934 = vmatprep.subr.bf16.mxu1 %v2671_v11 }
  0x4c   :  { %1904 = vmatpush1.bf16.msra.mxu0 %v2678_v15 }
  0x4d   :  { %1936 = vmatpush1.bf16.msra.mxu1 %v2682_v19  ;;  %1906 = vmatprep.subr.bf16.mxu0 %v2686_v24 }
  0x4e   :  { %1938 = vmatprep.subr.bf16.mxu1 %v2690_v28 }
  0x50   :  { %1908 = vmatpush1.bf16.msra.mxu0 %v2697_v33 }
  0x51   :  { %1940 = vmatpush1.bf16.msra.mxu1 %v2701_v39  ;;  %1910 = vmatprep.subr.bf16.mxu0 %v2705_v43 }
  0x52   :  { %1942 = vmatprep.subr.bf16.mxu1 %v2709_v46 }
  0x54   :  { %1912 = vmatpush1.bf16.msra.mxu0 %v2716_v52 }
  0x55   :  { %1944 = vmatpush1.bf16.msra.mxu1 %v2720_v56  ;;  %1914 = vmatprep.subr.bf16.mxu0 %v2724_v60 }
  0x56   :  { %1946 = vmatprep.subr.bf16.mxu1 %v2728_v1 }
  0x58   :  { %1916 = vmatpush1.bf16.msra.mxu0 %v2735_v4 }
  0x59   :  { %1948 = vmatpush1.bf16.msra.mxu1 %v2739_v6  ;;  %1950 = vmatprep.subr.bf16.mxu0 %v2601_v17 }
  0x5a   :  { %1982 = vmatprep.subr.bf16.mxu1 %v2603_v21 }
 0x10e   :  { %v498_v23 = vpop.f32.mrb[0].mxu0 }
 0x10f   :  { %v2333_v26 = vadd.f32 %v498_v23, %v2791_v16  ;;  %v569_v27 = vpop.f32.mrb[0].mxu1  ;;  %v500_v30 = vpop.f32.mrb[1].mxu0 }
 0x110   :  { %v2334_v31 = vadd.f32 %v500_v30, %v2793_v18  ;;  %v571_v32 = vpop.f32.mrb[1].mxu1  ;;  %v2349_v36 = vadd.f32 %v569_v27, %v2795_v20 }
 0x111   :  { %2402 = vtanh.f32 %v2333_v26  ;;  %v2350_v41 = vadd.f32 %v571_v32, %v2800_v40 }
 0x112   :  { %2404 = vtanh.f32 %v2334_v31 }
 0x113   :  { %2406 = vtanh.f32 %v2349_v36 }
 0x114   :  { %2408 = vtanh.f32 %v2350_v41 }
 0x11b   :  { %v2403_v44 = vpop.eup %2402 }
 0x11c   :  { %v582_v45 = vadd.f32 1.0, %v2403_v44  ;;  %v2405_v48 = vpop.eup %2404 }
 0x11d   :  { %v584_v51 = vadd.f32 1.0, %v2405_v48  ;;  %v2407_v53 = vpop.eup %2406 }
 0x11e   :  { %v583_v49 = vmul.f32 0.5, %v582_v45  ;;  %v2409_v63 = vpop.eup %2408 }
 0x11f   :  { %v585_v55 = vmul.f32 0.5, %v584_v51  ;;  %v586_v3 = vadd.f32 1.0, %v2409_v63 }
 0x120   :  { %v589_v57 = vmul.f32 %v2407_v53, %v583_v49 }
 0x121   :  { %v588_v59 = vmul.f32 0.0, %v585_v55  ;;  %v587_v7 = vmul.f32 0.5, %v586_v3 }
 0x123   :  { %v2803_v62 = vadd.f32 %v589_v57, %v588_v59 }
 0x125   :  { %2410 = vtanh.f32 %v2803_v62 }
 0x12f   :  { %v2411_v9 = vpop.eup %2410 }
 0x130   :  { %v592_v10 = vmul.f32 %v2411_v9, %v587_v7 }
 0x132   :  { %665 = vmatmul.mubr.f32.vlgmr.msra.gmra.mrb[2].mxu0 %v592_v10  ;;  %736 = vmatmul.mubr.f32.vlgmr.msra.gmra.mrb[2].mxu1 %v592_v10 }
 0x133   :  { %1952 = vmatpush1.bf16.msra.mxu0 %v2605_v22  ;;  %1984 = vmatpush1.bf16.msra.mxu1 %v2608_v25 }
 0x134   :  { %1954 = vmatprep.subr.bf16.mxu0 %v2612_v29  ;;  %1986 = vmatprep.subr.bf16.mxu1 %v2619_v34 }
 0x135   :  { %832 = vmatprep.mubr.f32.mxu0 %v2533_v0  ;;  %903 = vmatprep.mubr.f32.mxu1 %v2533_v0 }
 0x137   :  { %1956 = vmatpush1.bf16.msra.mxu0 %v2621_v35  ;;  %1988 = vmatpush1.bf16.msra.mxu1 %v2625_v38 }
 0x138   :  { %1958 = vmatprep.subr.bf16.mxu0 %v2629_v42  ;;  %1990 = vmatprep.subr.bf16.mxu1 %v2636_v47 }
 0x13b   :  { %1960 = vmatpush1.bf16.msra.mxu0 %v2640_v50  ;;  %1992 = vmatpush1.bf16.msra.mxu1 %v2644_v54 }
 0x13c   :  { %1962 = vmatprep.subr.bf16.mxu0 %v2648_v58  ;;  %1994 = vmatprep.subr.bf16.mxu1 %v2652_v61 }
 0x13f   :  { %1964 = vmatpush1.bf16.msra.mxu0 %v2659_v2  ;;  %1996 = vmatpush1.bf16.msra.mxu1 %v2663_v5 }
 0x140   :  { %1966 = vmatprep.subr.bf16.mxu0 %v2667_v8  ;;  %1998 = vmatprep.subr.bf16.mxu1 %v2671_v11 }
 0x143   :  { %1968 = vmatpush1.bf16.msra.mxu0 %v2678_v15  ;;  %2000 = vmatpush1.bf16.msra.mxu1 %v2682_v19 }
 0x144   :  { %1970 = vmatprep.subr.bf16.mxu0 %v2686_v24  ;;  %2002 = vmatprep.subr.bf16.mxu1 %v2690_v28 }
 0x147   :  { %1972 = vmatpush1.bf16.msra.mxu0 %v2697_v33  ;;  %2004 = vmatpush1.bf16.msra.mxu1 %v2701_v39 }
 0x148   :  { %1974 = vmatprep.subr.bf16.mxu0 %v2705_v43  ;;  %2006 = vmatprep.subr.bf16.mxu1 %v2709_v46 }
 0x14b   :  { %1976 = vmatpush1.bf16.msra.mxu0 %v2716_v52  ;;  %2008 = vmatpush1.bf16.msra.mxu1 %v2720_v56 }
 0x14c   :  { %1978 = vmatprep.subr.bf16.mxu0 %v2724_v60  ;;  %2010 = vmatprep.subr.bf16.mxu1 %v2728_v1 }
 0x14f   :  { %1980 = vmatpush1.bf16.msra.mxu0 %v2735_v4  ;;  %2012 = vmatpush1.bf16.msra.mxu1 %v2739_v6 }
 0x150   :  { %2014 = vmatprep.subr.bf16.mxu0 %v2601_v17  ;;  %2046 = vmatprep.subr.bf16.mxu1 %v2603_v21 }
 0x205   :  { %v666_v12 = vpop.f32.mrb[2].mxu0  ;;  %v737_v13 = vpop.f32.mrb[2].mxu1 }
 0x206   :  { %v2335_v14 = vadd.f32 %v666_v12, %v2791_v16  ;;  %v668_v23 = vpop.f32.mrb[3].mxu0  ;;  %v739_v26 = vpop.f32.mrb[3].mxu1  ;;  %v2351_v30 = vadd.f32 %v737_v13, %v2795_v20 }
 0x207   :  { %v2336_v27 = vadd.f32 %v668_v23, %v2793_v18  ;;  %v2352_v31 = vadd.f32 %v739_v26, %v2800_v40 }
 0x208   :  { %2412 = vtanh.f32 %v2335_v14 }
 0x209   :  { %2414 = vtanh.f32 %v2336_v27 }
 0x20a   :  { %2416 = vtanh.f32 %v2351_v30 }
 0x20b   :  { %2418 = vtanh.f32 %v2352_v31 }
 0x212   :  { %v2413_v32 = vpop.eup %2412 }
 0x213   :  { %v750_v36 = vadd.f32 1.0, %v2413_v32  ;;  %v2415_v37 = vpop.eup %2414 }
 0x214   :  { %v752_v44 = vadd.f32 1.0, %v2415_v37  ;;  %v2417_v45 = vpop.eup %2416 }
 0x215   :  { %v751_v41 = vmul.f32 0.5, %v750_v36  ;;  %v2419_v55 = vpop.eup %2418 }
 0x216   :  { %v753_v48 = vmul.f32 0.5, %v752_v44  ;;  %v754_v57 = vadd.f32 1.0, %v2419_v55 }
 0x217   :  { %v757_v49 = vmul.f32 %v2417_v45, %v751_v41 }
 0x218   :  { %v756_v51 = vmul.f32 %v753_v48, %v2803_v62  ;;  %v755_v59 = vmul.f32 0.5, %v754_v57 }
 0x21a   :  { %v2845_v53 = vadd.f32 %v757_v49, %v756_v51 }
 0x21c   :  { %2420 = vtanh.f32 %v2845_v53 }
 0x226   :  { %v2421_v63 = vpop.eup %2420 }
 0x227   :  { %v760_v3 = vmul.f32 %v2421_v63, %v755_v59 }
 0x229   :  { %833 = vmatmul.mubr.f32.vlgmr.msra.gmra.mrb[4].mxu0 %v760_v3  ;;  %904 = vmatmul.mubr.f32.vlgmr.msra.gmra.mrb[4].mxu1 %v760_v3 }
 0x22a   :  { %2016 = vmatpush1.bf16.msra.mxu0 %v2605_v22  ;;  %2048 = vmatpush1.bf16.msra.mxu1 %v2608_v25 }
 0x22b   :  { %2018 = vmatprep.subr.bf16.mxu0 %v2612_v29  ;;  %2050 = vmatprep.subr.bf16.mxu1 %v2619_v34 }
 0x22c   :  { %1000 = vmatprep.mubr.f32.mxu0 %v2533_v0  ;;  %1071 = vmatprep.mubr.f32.mxu1 %v2533_v0 }
 0x22e   :  { %2020 = vmatpush1.bf16.msra.mxu0 %v2621_v35  ;;  %2052 = vmatpush1.bf16.msra.mxu1 %v2625_v38 }
 0x22f   :  { %2022 = vmatprep.subr.bf16.mxu0 %v2629_v42  ;;  %2054 = vmatprep.subr.bf16.mxu1 %v2636_v47 }
 0x232   :  { %2024 = vmatpush1.bf16.msra.mxu0 %v2640_v50  ;;  %2056 = vmatpush1.bf16.msra.mxu1 %v2644_v54 }
 0x233   :  { %2026 = vmatprep.subr.bf16.mxu0 %v2648_v58  ;;  %2058 = vmatprep.subr.bf16.mxu1 %v2652_v61 }
 0x236   :  { %2028 = vmatpush1.bf16.msra.mxu0 %v2659_v2  ;;  %2060 = vmatpush1.bf16.msra.mxu1 %v2663_v5 }
 0x237   :  { %2030 = vmatprep.subr.bf16.mxu0 %v2667_v8  ;;  %2062 = vmatprep.subr.bf16.mxu1 %v2671_v11 }
 0x23a   :  { %2032 = vmatpush1.bf16.msra.mxu0 %v2678_v15  ;;  %2064 = vmatpush1.bf16.msra.mxu1 %v2682_v19 }
 0x23b   :  { %2034 = vmatprep.subr.bf16.mxu0 %v2686_v24  ;;  %2066 = vmatprep.subr.bf16.mxu1 %v2690_v28 }
 0x23e   :  { %2036 = vmatpush1.bf16.msra.mxu0 %v2697_v33  ;;  %2068 = vmatpush1.bf16.msra.mxu1 %v2701_v39 }
 0x23f   :  { %2038 = vmatprep.subr.bf16.mxu0 %v2705_v43  ;;  %2070 = vmatprep.subr.bf16.mxu1 %v2709_v46 }
 0x242   :  { %2040 = vmatpush1.bf16.msra.mxu0 %v2716_v52  ;;  %2072 = vmatpush1.bf16.msra.mxu1 %v2720_v56 }
 0x243   :  { %2042 = vmatprep.subr.bf16.mxu0 %v2724_v60  ;;  %2074 = vmatprep.subr.bf16.mxu1 %v2728_v1 }
 0x246   :  { %2044 = vmatpush1.bf16.msra.mxu0 %v2735_v4  ;;  %2076 = vmatpush1.bf16.msra.mxu1 %v2739_v6 }
 0x247   :  { %2078 = vmatprep.subr.bf16.mxu0 %v2601_v17  ;;  %2110 = vmatprep.subr.bf16.mxu1 %v2603_v21 }
 0x2fc   :  { %v834_v62 = vpop.f32.mrb[4].mxu0  ;;  %v905_v7 = vpop.f32.mrb[4].mxu1 }
 0x2fd   :  { %v2337_v9 = vadd.f32 %v834_v62, %v2791_v16  ;;  %v836_v10 = vpop.f32.mrb[5].mxu0  ;;  %v907_v12 = vpop.f32.mrb[5].mxu1  ;;  %v2353_v14 = vadd.f32 %v905_v7, %v2795_v20 }
 0x2fe   :  { %v2338_v13 = vadd.f32 %v836_v10, %v2793_v18  ;;  %v2354_v23 = vadd.f32 %v907_v12, %v2800_v40 }
 0x2ff   :  { %2422 = vtanh.f32 %v2337_v9 }
 0x300   :  { %2424 = vtanh.f32 %v2338_v13 }
 0x301   :  { %2426 = vtanh.f32 %v2353_v14 }
 0x302   :  { %2428 = vtanh.f32 %v2354_v23 }
 0x309   :  { %v2423_v26 = vpop.eup %2422 }
 0x30a   :  { %v918_v27 = vadd.f32 1.0, %v2423_v26  ;;  %v2425_v30 = vpop.eup %2424 }
 0x30b   :  { %v920_v32 = vadd.f32 1.0, %v2425_v30  ;;  %v2427_v36 = vpop.eup %2426 }
 0x30c   :  { %v919_v31 = vmul.f32 0.5, %v918_v27  ;;  %v2429_v48 = vpop.eup %2428 }
 0x30d   :  { %v921_v37 = vmul.f32 0.5, %v920_v32  ;;  %v922_v49 = vadd.f32 1.0, %v2429_v48 }
 0x30e   :  { %v925_v41 = vmul.f32 %v2427_v36, %v919_v31 }
 0x30f   :  { %v924_v44 = vmul.f32 %v921_v37, %v2845_v53  ;;  %v923_v51 = vmul.f32 0.5, %v922_v49 }
 0x311   :  { %v2887_v45 = vadd.f32 %v925_v41, %v924_v44 }
 0x313   :  { %2430 = vtanh.f32 %v2887_v45 }
 0x31d   :  { %v2431_v55 = vpop.eup %2430 }
 0x31e   :  { %v928_v57 = vmul.f32 %v2431_v55, %v923_v51 }
 0x320   :  { %1001 = vmatmul.mubr.f32.vlgmr.msra.gmra.mrb[6].mxu0 %v928_v57  ;;  %1072 = vmatmul.mubr.f32.vlgmr.msra.gmra.mrb[6].mxu1 %v928_v57 }
 0x321   :  { %2080 = vmatpush1.bf16.msra.mxu0 %v2605_v22  ;;  %2112 = vmatpush1.bf16.msra.mxu1 %v2608_v25 }
 0x322   :  { %2082 = vmatprep.subr.bf16.mxu0 %v2612_v29  ;;  %2114 = vmatprep.subr.bf16.mxu1 %v2619_v34 }
 0x323   :  { %1168 = vmatprep.mubr.f32.mxu0 %v2533_v0  ;;  %1239 = vmatprep.mubr.f32.mxu1 %v2533_v0 }
 0x325   :  { %2084 = vmatpush1.bf16.msra.mxu0 %v2621_v35  ;;  %2116 = vmatpush1.bf16.msra.mxu1 %v2625_v38 }
 0x326   :  { %2086 = vmatprep.subr.bf16.mxu0 %v2629_v42  ;;  %2118 = vmatprep.subr.bf16.mxu1 %v2636_v47 }
 0x329   :  { %2088 = vmatpush1.bf16.msra.mxu0 %v2640_v50  ;;  %2120 = vmatpush1.bf16.msra.mxu1 %v2644_v54 }
 0x32a   :  { %2090 = vmatprep.subr.bf16.mxu0 %v2648_v58  ;;  %2122 = vmatprep.subr.bf16.mxu1 %v2652_v61 }
 0x32d   :  { %2092 = vmatpush1.bf16.msra.mxu0 %v2659_v2  ;;  %2124 = vmatpush1.bf16.msra.mxu1 %v2663_v5 }
 0x32e   :  { %2094 = vmatprep.subr.bf16.mxu0 %v2667_v8  ;;  %2126 = vmatprep.subr.bf16.mxu1 %v2671_v11 }
 0x331   :  { %2096 = vmatpush1.bf16.msra.mxu0 %v2678_v15  ;;  %2128 = vmatpush1.bf16.msra.mxu1 %v2682_v19 }
 0x332   :  { %2098 = vmatprep.subr.bf16.mxu0 %v2686_v24  ;;  %2130 = vmatprep.subr.bf16.mxu1 %v2690_v28 }
 0x335   :  { %2100 = vmatpush1.bf16.msra.mxu0 %v2697_v33  ;;  %2132 = vmatpush1.bf16.msra.mxu1 %v2701_v39 }
 0x336   :  { %2102 = vmatprep.subr.bf16.mxu0 %v2705_v43  ;;  %2134 = vmatprep.subr.bf16.mxu1 %v2709_v46 }
 0x339   :  { %2104 = vmatpush1.bf16.msra.mxu0 %v2716_v52  ;;  %2136 = vmatpush1.bf16.msra.mxu1 %v2720_v56 }
 0x33a   :  { %2106 = vmatprep.subr.bf16.mxu0 %v2724_v60  ;;  %2138 = vmatprep.subr.bf16.mxu1 %v2728_v1 }
 0x33d   :  { %2108 = vmatpush1.bf16.msra.mxu0 %v2735_v4  ;;  %2140 = vmatpush1.bf16.msra.mxu1 %v2739_v6 }
 0x33e   :  { %2142 = vmatprep.subr.bf16.mxu0 %v2601_v17  ;;  %2174 = vmatprep.subr.bf16.mxu1 %v2603_v21 }
 0x3f3   :  { %v1002_v53 = vpop.f32.mrb[6].mxu0  ;;  %v1073_v59 = vpop.f32.mrb[6].mxu1 }
 0x3f4   :  { %v2339_v63 = vadd.f32 %v1002_v53, %v2791_v16  ;;  %v1004_v3 = vpop.f32.mrb[7].mxu0  ;;  %v1075_v62 = vpop.f32.mrb[7].mxu1  ;;  %v2355_v9 = vadd.f32 %v1073_v59, %v2795_v20 }
 0x3f5   :  { %v2340_v7 = vadd.f32 %v1004_v3, %v2793_v18  ;;  %v2356_v10 = vadd.f32 %v1075_v62, %v2800_v40 }
 0x3f6   :  { %2432 = vtanh.f32 %v2339_v63 }
 0x3f7   :  { %2434 = vtanh.f32 %v2340_v7 }
 0x3f8   :  { %2436 = vtanh.f32 %v2355_v9 }
 0x3f9   :  { %2438 = vtanh.f32 %v2356_v10 }
 0x400   :  { %v2433_v12 = vpop.eup %2432 }
 0x401   :  { %v1086_v13 = vadd.f32 1.0, %v2433_v12  ;;  %v2435_v14 = vpop.eup %2434 }
 0x402   :  { %v1088_v26 = vadd.f32 1.0, %v2435_v14  ;;  %v2437_v27 = vpop.eup %2436 }
 0x403   :  { %v1087_v23 = vmul.f32 0.5, %v1086_v13  ;;  %v2439_v37 = vpop.eup %2438 }
 0x404   :  { %v1089_v30 = vmul.f32 0.5, %v1088_v26  ;;  %v1090_v41 = vadd.f32 1.0, %v2439_v37 }
 0x405   :  { %v1093_v31 = vmul.f32 %v2437_v27, %v1087_v23 }
 0x406   :  { %v1092_v32 = vmul.f32 %v1089_v30, %v2887_v45  ;;  %v1091_v44 = vmul.f32 0.5, %v1090_v41 }
 0x408   :  { %v2929_v36 = vadd.f32 %v1093_v31, %v1092_v32 }
 0x40a   :  { %2440 = vtanh.f32 %v2929_v36 }
 0x414   :  { %v2441_v48 = vpop.eup %2440 }
 0x415   :  { %v1096_v49 = vmul.f32 %v2441_v48, %v1091_v44 }
 0x417   :  { %1169 = vmatmul.mubr.f32.vlgmr.msra.gmra.mrb[8].mxu0 %v1096_v49  ;;  %1240 = vmatmul.mubr.f32.vlgmr.msra.gmra.mrb[8].mxu1 %v1096_v49 }
 0x418   :  { %2144 = vmatpush1.bf16.msra.mxu0 %v2605_v22  ;;  %2176 = vmatpush1.bf16.msra.mxu1 %v2608_v25 }
 0x419   :  { %2146 = vmatprep.subr.bf16.mxu0 %v2612_v29  ;;  %2178 = vmatprep.subr.bf16.mxu1 %v2619_v34 }
 0x41a   :  { %1336 = vmatprep.mubr.f32.mxu0 %v2533_v0  ;;  %1407 = vmatprep.mubr.f32.mxu1 %v2533_v0 }
 0x41c   :  { %2148 = vmatpush1.bf16.msra.mxu0 %v2621_v35  ;;  %2180 = vmatpush1.bf16.msra.mxu1 %v2625_v38 }
 0x41d   :  { %2150 = vmatprep.subr.bf16.mxu0 %v2629_v42  ;;  %2182 = vmatprep.subr.bf16.mxu1 %v2636_v47 }
 0x420   :  { %2152 = vmatpush1.bf16.msra.mxu0 %v2640_v50  ;;  %2184 = vmatpush1.bf16.msra.mxu1 %v2644_v54 }
 0x421   :  { %2154 = vmatprep.subr.bf16.mxu0 %v2648_v58  ;;  %2186 = vmatprep.subr.bf16.mxu1 %v2652_v61 }
 0x424   :  { %2156 = vmatpush1.bf16.msra.mxu0 %v2659_v2  ;;  %2188 = vmatpush1.bf16.msra.mxu1 %v2663_v5 }
 0x425   :  { %2158 = vmatprep.subr.bf16.mxu0 %v2667_v8  ;;  %2190 = vmatprep.subr.bf16.mxu1 %v2671_v11 }
 0x428   :  { %2160 = vmatpush1.bf16.msra.mxu0 %v2678_v15  ;;  %2192 = vmatpush1.bf16.msra.mxu1 %v2682_v19 }
 0x429   :  { %2162 = vmatprep.subr.bf16.mxu0 %v2686_v24  ;;  %2194 = vmatprep.subr.bf16.mxu1 %v2690_v28 }
 0x42c   :  { %2164 = vmatpush1.bf16.msra.mxu0 %v2697_v33  ;;  %2196 = vmatpush1.bf16.msra.mxu1 %v2701_v39 }
 0x42d   :  { %2166 = vmatprep.subr.bf16.mxu0 %v2705_v43  ;;  %2198 = vmatprep.subr.bf16.mxu1 %v2709_v46 }
 0x430   :  { %2168 = vmatpush1.bf16.msra.mxu0 %v2716_v52  ;;  %2200 = vmatpush1.bf16.msra.mxu1 %v2720_v56 }
 0x431   :  { %2170 = vmatprep.subr.bf16.mxu0 %v2724_v60  ;;  %2202 = vmatprep.subr.bf16.mxu1 %v2728_v1 }
 0x434   :  { %2172 = vmatpush1.bf16.msra.mxu0 %v2735_v4  ;;  %2204 = vmatpush1.bf16.msra.mxu1 %v2739_v6 }
 0x435   :  { %2206 = vmatprep.subr.bf16.mxu0 %v2601_v17  ;;  %2238 = vmatprep.subr.bf16.mxu1 %v2603_v21 }
 0x4ea   :  { %v1170_v45 = vpop.f32.mrb[8].mxu0  ;;  %v1241_v51 = vpop.f32.mrb[8].mxu1 }
 0x4eb   :  { %v2341_v55 = vadd.f32 %v1170_v45, %v2791_v16  ;;  %v1172_v57 = vpop.f32.mrb[9].mxu0  ;;  %v1243_v53 = vpop.f32.mrb[9].mxu1  ;;  %v2357_v63 = vadd.f32 %v1241_v51, %v2795_v20 }
 0x4ec   :  { %v2342_v59 = vadd.f32 %v1172_v57, %v2793_v18  ;;  %v2358_v3 = vadd.f32 %v1243_v53, %v2800_v40 }
 0x4ed   :  { %2442 = vtanh.f32 %v2341_v55 }
 0x4ee   :  { %2444 = vtanh.f32 %v2342_v59 }
 0x4ef   :  { %2446 = vtanh.f32 %v2357_v63 }
 0x4f0   :  { %2448 = vtanh.f32 %v2358_v3 }
 0x4f7   :  { %v2443_v62 = vpop.eup %2442 }
 0x4f8   :  { %v1254_v7 = vadd.f32 1.0, %v2443_v62  ;;  %v2445_v9 = vpop.eup %2444 }
 0x4f9   :  { %v1256_v12 = vadd.f32 1.0, %v2445_v9  ;;  %v2447_v13 = vpop.eup %2446 }
 0x4fa   :  { %v1255_v10 = vmul.f32 0.5, %v1254_v7  ;;  %v2449_v30 = vpop.eup %2448 }
 0x4fb   :  { %v1257_v14 = vmul.f32 0.5, %v1256_v12  ;;  %v1258_v31 = vadd.f32 1.0, %v2449_v30 }
 0x4fc   :  { %v1261_v23 = vmul.f32 %v2447_v13, %v1255_v10 }
 0x4fd   :  { %v1260_v26 = vmul.f32 %v1257_v14, %v2929_v36  ;;  %v1259_v32 = vmul.f32 0.5, %v1258_v31 }
 0x4ff   :  { %v2971_v27 = vadd.f32 %v1261_v23, %v1260_v26 }
 0x501   :  { %2450 = vtanh.f32 %v2971_v27 }
 0x50b   :  { %v2451_v37 = vpop.eup %2450 }
 0x50c   :  { %v1264_v41 = vmul.f32 %v2451_v37, %v1259_v32 }
 0x50e   :  { %1337 = vmatmul.mubr.f32.vlgmr.msra.gmra.mrb[10].mxu0 %v1264_v41  ;;  %1408 = vmatmul.mubr.f32.vlgmr.msra.gmra.mrb[10].mxu1 %v1264_v41 }
 0x50f   :  { %2208 = vmatpush1.bf16.msra.mxu0 %v2605_v22  ;;  %2240 = vmatpush1.bf16.msra.mxu1 %v2608_v25 }
 0x510   :  { %2210 = vmatprep.subr.bf16.mxu0 %v2612_v29  ;;  %2242 = vmatprep.subr.bf16.mxu1 %v2619_v34 }
 0x511   :  { %1504 = vmatprep.mubr.f32.mxu0 %v2533_v0  ;;  %1575 = vmatprep.mubr.f32.mxu1 %v2533_v0 }
 0x513   :  { %2212 = vmatpush1.bf16.msra.mxu0 %v2621_v35  ;;  %2244 = vmatpush1.bf16.msra.mxu1 %v2625_v38 }
 0x514   :  { %2214 = vmatprep.subr.bf16.mxu0 %v2629_v42  ;;  %2246 = vmatprep.subr.bf16.mxu1 %v2636_v47 }
 0x517   :  { %2216 = vmatpush1.bf16.msra.mxu0 %v2640_v50  ;;  %2248 = vmatpush1.bf16.msra.mxu1 %v2644_v54 }
 0x518   :  { %2218 = vmatprep.subr.bf16.mxu0 %v2648_v58  ;;  %2250 = vmatprep.subr.bf16.mxu1 %v2652_v61 }
 0x51b   :  { %2220 = vmatpush1.bf16.msra.mxu0 %v2659_v2  ;;  %2252 = vmatpush1.bf16.msra.mxu1 %v2663_v5 }
 0x51c   :  { %2222 = vmatprep.subr.bf16.mxu0 %v2667_v8  ;;  %2254 = vmatprep.subr.bf16.mxu1 %v2671_v11 }
 0x51f   :  { %2224 = vmatpush1.bf16.msra.mxu0 %v2678_v15  ;;  %2256 = vmatpush1.bf16.msra.mxu1 %v2682_v19 }
 0x520   :  { %2226 = vmatprep.subr.bf16.mxu0 %v2686_v24  ;;  %2258 = vmatprep.subr.bf16.mxu1 %v2690_v28 }
 0x523   :  { %2228 = vmatpush1.bf16.msra.mxu0 %v2697_v33  ;;  %2260 = vmatpush1.bf16.msra.mxu1 %v2701_v39 }
 0x524   :  { %2230 = vmatprep.subr.bf16.mxu0 %v2705_v43  ;;  %2262 = vmatprep.subr.bf16.mxu1 %v2709_v46 }
 0x527   :  { %2232 = vmatpush1.bf16.msra.mxu0 %v2716_v52  ;;  %2264 = vmatpush1.bf16.msra.mxu1 %v2720_v56 }
 0x528   :  { %2234 = vmatprep.subr.bf16.mxu0 %v2724_v60  ;;  %2266 = vmatprep.subr.bf16.mxu1 %v2728_v1 }
 0x52b   :  { %2236 = vmatpush1.bf16.msra.mxu0 %v2735_v4  ;;  %2268 = vmatpush1.bf16.msra.mxu1 %v2739_v6 }
 0x52c   :  { %2270 = vmatprep.subr.bf16.mxu0 %v2601_v17  ;;  %2302 = vmatprep.subr.bf16.mxu1 %v2603_v21 }
 0x5e1   :  { %v1338_v36 = vpop.f32.mrb[10].mxu0  ;;  %v1409_v44 = vpop.f32.mrb[10].mxu1 }
 0x5e2   :  { %v2343_v48 = vadd.f32 %v1338_v36, %v2791_v16  ;;  %v1340_v49 = vpop.f32.mrb[11].mxu0  ;;  %v1411_v45 = vpop.f32.mrb[11].mxu1  ;;  %v2359_v55 = vadd.f32 %v1409_v44, %v2795_v20 }
 0x5e3   :  { %v2344_v51 = vadd.f32 %v1340_v49, %v2793_v18  ;;  %v2360_v57 = vadd.f32 %v1411_v45, %v2800_v40 }
 0x5e4   :  { %2452 = vtanh.f32 %v2343_v48 }
 0x5e5   :  { %2454 = vtanh.f32 %v2344_v51 }
 0x5e6   :  { %2456 = vtanh.f32 %v2359_v55 }
 0x5e7   :  { %2458 = vtanh.f32 %v2360_v57 }
 0x5ee   :  { %v2453_v53 = vpop.eup %2452 }
 0x5ef   :  { %v1422_v59 = vadd.f32 1.0, %v2453_v53  ;;  %v2455_v17 = vpop.eup %2454 }
 0x5f0   :  { %v1424_v21 = vadd.f32 1.0, %v2455_v17  ;;  %v2457_v3 = vpop.eup %2456 }
 0x5f1   :  { %v1423_v63 = vmul.f32 0.5, %v1422_v59  ;;  %v2459_v12 = vpop.eup %2458 }
 0x5f2   :  { %v1425_v62 = vmul.f32 0.5, %v1424_v21  ;;  %v1426_v13 = vadd.f32 1.0, %v2459_v12 }
 0x5f3   :  { %v1429_v7 = vmul.f32 %v2457_v3, %v1423_v63 }
 0x5f4   :  { %v1428_v9 = vmul.f32 %v1425_v62, %v2971_v27  ;;  %v1427_v14 = vmul.f32 0.5, %v1426_v13 }
 0x5f6   :  { %v1430_v10 = vadd.f32 %v1429_v7, %v1428_v9 }
 0x5f8   :  { %2460 = vtanh.f32 %v1430_v10 }
 0x602   :  { %v2461_v23 = vpop.eup %2460 }
 0x603   :  { %v1432_v26 = vmul.f32 %v2461_v23, %v1427_v14 }
 0x605   :  { %1505 = vmatmul.mubr.f32.vlgmr.msra.gmra.mrb[12].mxu0 %v1432_v26  ;;  %1576 = vmatmul.mubr.f32.vlgmr.msra.gmra.mrb[12].mxu1 %v1432_v26 }
 0x606   :  { %2272 = vmatpush1.bf16.msra.mxu0 %v2605_v22  ;;  %2304 = vmatpush1.bf16.msra.mxu1 %v2608_v25 }
 0x607   :  { %2274 = vmatprep.subr.bf16.mxu0 %v2612_v29  ;;  %2306 = vmatprep.subr.bf16.mxu1 %v2619_v34 }
 0x608   :  { %1672 = vmatprep.mubr.f32.mxu0 %v2533_v0  ;;  %1743 = vmatprep.mubr.f32.mxu1 %v2533_v0 }
 0x60a   :  { %2276 = vmatpush1.bf16.msra.mxu0 %v2621_v35  ;;  %2308 = vmatpush1.bf16.msra.mxu1 %v2625_v38 }
 0x60b   :  { %2278 = vmatprep.subr.bf16.mxu0 %v2629_v42  ;;  %2310 = vmatprep.subr.bf16.mxu1 %v2636_v47 }
 0x60e   :  { %2280 = vmatpush1.bf16.msra.mxu0 %v2640_v50  ;;  %2312 = vmatpush1.bf16.msra.mxu1 %v2644_v54 }
 0x60f   :  { %2282 = vmatprep.subr.bf16.mxu0 %v2648_v58  ;;  %2314 = vmatprep.subr.bf16.mxu1 %v2652_v61 }
 0x612   :  { %2284 = vmatpush1.bf16.msra.mxu0 %v2659_v2  ;;  %2316 = vmatpush1.bf16.msra.mxu1 %v2663_v5 }
 0x613   :  { %2286 = vmatprep.subr.bf16.mxu0 %v2667_v8  ;;  %2318 = vmatprep.subr.bf16.mxu1 %v2671_v11 }
 0x616   :  { %2288 = vmatpush1.bf16.msra.mxu0 %v2678_v15  ;;  %2320 = vmatpush1.bf16.msra.mxu1 %v2682_v19 }
 0x617   :  { %2290 = vmatprep.subr.bf16.mxu0 %v2686_v24  ;;  %2322 = vmatprep.subr.bf16.mxu1 %v2690_v28 }
 0x61a   :  { %2292 = vmatpush1.bf16.msra.mxu0 %v2697_v33  ;;  %2324 = vmatpush1.bf16.msra.mxu1 %v2701_v39 }
 0x61b   :  { %2294 = vmatprep.subr.bf16.mxu0 %v2705_v43  ;;  %2326 = vmatprep.subr.bf16.mxu1 %v2709_v46 }
 0x61e   :  { %2296 = vmatpush1.bf16.msra.mxu0 %v2716_v52  ;;  %2328 = vmatpush1.bf16.msra.mxu1 %v2720_v56 }
 0x61f   :  { %2298 = vmatprep.subr.bf16.mxu0 %v2724_v60  ;;  %2330 = vmatprep.subr.bf16.mxu1 %v2728_v1 }
 0x622   :  { %2300 = vmatpush1.bf16.msra.mxu0 %v2735_v4  ;;  %2332 = vmatpush1.bf16.msra.mxu1 %v2739_v6 }
 0x6d8   :  { %v1506_v0 = vpop.f32.mrb[12].mxu0  ;;  %v1577_v22 = vpop.f32.mrb[12].mxu1 }
 0x6d9   :  { %v2345_v25 = vadd.f32 %v1506_v0, %v2791_v16  ;;  %v1508_v29 = vpop.f32.mrb[13].mxu0  ;;  %v1579_v34 = vpop.f32.mrb[13].mxu1  ;;  %v2361_v38 = vadd.f32 %v1577_v22, %v2795_v20 }
 0x6da   :  { %v2346_v35 = vadd.f32 %v1508_v29, %v2793_v18  ;;  %v2362_v42 = vadd.f32 %v1579_v34, %v2800_v40 }
 0x6db   :  { %2462 = vtanh.f32 %v2345_v25 }
 0x6dc   :  { %2464 = vtanh.f32 %v2346_v35 }
 0x6dd   :  { %2466 = vtanh.f32 %v2361_v38 }
 0x6de   :  { %2468 = vtanh.f32 %v2362_v42 }
 0x6e5   :  { %v2463_v47 = vpop.eup %2462 }
 0x6e6   :  { %v1590_v50 = vadd.f32 1.0, %v2463_v47  ;;  %v2465_v54 = vpop.eup %2464 }
 0x6e7   :  { %v1592_v61 = vadd.f32 1.0, %v2465_v54  ;;  %v2467_v2 = vpop.eup %2466 }
 0x6e8   :  { %v1591_v58 = vmul.f32 0.5, %v1590_v50  ;;  %v2469_v19 = vpop.eup %2468 }
 0x6e9   :  { %v1593_v5 = vmul.f32 0.5, %v1592_v61  ;;  %v1594_v24 = vadd.f32 1.0, %v2469_v19 }
 0x6ea   :  { %v1597_v8 = vmul.f32 %v2467_v2, %v1591_v58 }
 0x6eb   :  { %v1596_v11 = vmul.f32 %v1593_v5, %v1430_v10  ;;  %v1595_v28 = vmul.f32 0.5, %v1594_v24 }
 0x6ed   :  { %v1598_v15 = vadd.f32 %v1597_v8, %v1596_v11 }
 0x6ef   :  { %2470 = vtanh.f32 %v1598_v15 }
 0x6f9   :  { %v2471_v33 = vpop.eup %2470 }
 0x6fa   :  { %v1600_v39 = vmul.f32 %v2471_v33, %v1595_v28 }
 0x6fc   :  { %1673 = vmatmul.mubr.f32.vlgmr.msra.gmra.mrb[14].mxu0 %v1600_v39  ;;  %1744 = vmatmul.mubr.f32.vlgmr.msra.gmra.mrb[14].mxu1 %v1600_v39 }
 0x7cf   :  { %v1674_v43 = vpop.f32.mrb[14].mxu0  ;;  %v1745_v46 = vpop.f32.mrb[14].mxu1 }
 0x7d0   :  { %v2347_v52 = vadd.f32 %v1674_v43, %v2791_v16  ;;  %v1676_v56 = vpop.f32.mrb[15].mxu0  ;;  %v1747_v60 = vpop.f32.mrb[15].mxu1  ;;  %v2363_v4 = vadd.f32 %v1745_v46, %v2795_v20 }
 0x7d1   :  { %v2348_v1 = vadd.f32 %v1676_v56, %v2793_v18  ;;  %v2364_v6 = vadd.f32 %v1747_v60, %v2800_v40 }
 0x7d2   :  { %2472 = vtanh.f32 %v2347_v52 }
 0x7d3   :  { %2474 = vtanh.f32 %v2348_v1 }
 0x7d4   :  { %2476 = vtanh.f32 %v2363_v4 }
 0x7d5   :  { %2478 = vtanh.f32 %v2364_v6 }
 0x7dc   :  { %v2473_v27 = vpop.eup %2472 }
 0x7dd   :  { %v1758_v30 = vadd.f32 1.0, %v2473_v27  ;;  %v2475_v31 = vpop.eup %2474 }
 0x7de   :  { %v1760_v37 = vadd.f32 1.0, %v2475_v31  ;;  %v2477_v41 = vpop.eup %2476 }
 0x7df   :  { %v1759_v32 = vmul.f32 0.5, %v1758_v30  ;;  %v2479_v18 = vpop.eup %2478 }
 0x7e0   :  { %v1761_v36 = vmul.f32 0.5, %v1760_v37  ;;  %v1762_v49 = vadd.f32 1.0, %v2479_v18 }
 0x7e1   :  { %v1765_v16 = vmul.f32 %v2477_v41, %v1759_v32 }
 0x7e2   :  { %v1764_v44 = vmul.f32 %v1761_v36, %v1598_v15  ;;  %v1763_v20 = vmul.f32 0.5, %v1762_v49 }
 0x7e4   :  { %v1766_v48 = vadd.f32 %v1765_v16, %v1764_v44 }
 0x7e6   :  { %2480 = vtanh.f32 %v1766_v48 }
 0x7f0   :  { %v2481_v45 = vpop.eup %2480 }
 0x7f1   :  { %v1768_v51 = vmul.f32 %v2481_v45, %v1763_v20 }
 0x7f3   :  { %1774 = vst [vmem:[#allocation8] sm:$0xff] %v1768_v51 }
 0x7f4   :  { %2515 = shalt.err (!%p2512_p12)
}
 0x7f5   :  { %s2516_s11 = scalar_lea.hbm %s3069_s4, 128 }
 0x7f6   :  { %p2517_p13 = scmp.ne.s32.totalorder %s3069_s4, %s2516_s11  ;;  %p2520_p0 = scmp.lt.u32.totalorder %s2516_s11, %s3069_s4 }
 0x7f8   :  { %p2522_p1 = pnand %p2520_p0, %p2517_p13 }
 0x7fa   :  { %2525 = shalt.err (!%p2522_p1)
}
 0x7fb   :  { %1784 = dma.vmem_to_hbm [thread:$0]  %s1782_s8, 128, %s3069_s4, [#allocation7]  }
 0x7fc   :  { %2528 = dma.done.wait [#allocation7], 128  }
 0x7fd   :  { %2529 = vsyncadd [#allocation7], 4294967168 }
 0x7fe   :  { %1788 = vsyncpa [#allocation6], 1 }
 0x7ff   :  { %1789 = vsyncpa [#allocation7], 1 }

</bundles_post_ra>
